<compile_context>
chip_gen: v5e
topology: v5e:2x2
jax: 0.10.0
libtpu: 0.0.40
codegen_flags: <defaults>
</compile_context>

<pallas_src>
import functools

import jax
import jax.numpy as jnp
from jax.experimental import pallas as pl
from jax.experimental.pallas import tpu as pltpu

LANE = 128
_MIB = 1024 * 1024


def _round_up(x, m):
    return (x + m - 1) // m * m


def _pick_tile(n_pad, pref):
    """Largest divisor of n_pad that is <= pref (n_pad is a multiple of 128)."""
    t = min(pref, n_pad)
    while n_pad % t:
        t //= 2
    return max(t, LANE)


def _vmem_capacity_bytes():
    """Physical VMEM of the current TPU generation (conservative fallback = v7x)."""
    try:
        info = pltpu.get_tpu_info()
        cap = getattr(info, "vmem_capacity_bytes", None)
        if cap:
            return int(cap)
    except Exception:
        pass
    return 64 * _MIB


# ---------------------------------------------------------------------------
# Kernel 1: feature transform  H = X @ W  (row-tiled, bf16 in / bf16 out)
# ---------------------------------------------------------------------------
def _feature_transform_kernel(x_ref, w_ref, o_ref):
    o_ref[...] = jnp.dot(
        x_ref[...], w_ref[...], preferred_element_type=jnp.float32
    ).astype(o_ref.dtype)


def feature_transform(x_pad, w_pad, *, tm, vmem_limit, out_dtype=jnp.bfloat16):
    n_pad, f_pad = x_pad.shape
    out_p = w_pad.shape[1]
    return pl.pallas_call(
        _feature_transform_kernel,
        out_shape=jax.ShapeDtypeStruct((n_pad, out_p), out_dtype),
        grid=(n_pad // tm,),
        in_specs=[
            pl.BlockSpec((tm, f_pad), lambda i: (i, 0)),
            pl.BlockSpec((f_pad, out_p), lambda i: (0, 0)),   # weights resident
        ],
        out_specs=pl.BlockSpec((tm, out_p), lambda i: (i, 0)),
        compiler_params=pltpu.CompilerParams(
            dimension_semantics=("parallel",),
            vmem_limit_bytes=vmem_limit,
        ),
    )(x_pad, w_pad)


# ---------------------------------------------------------------------------
# Kernel 2: aggregation  Y = A_hat @ H + b (+ ReLU)
#   grid = (row tiles of A_hat  [parallel],  N reduction tiles  [arbitrary])
#   * resident_h=True : H given once as a full-array VMEM block (constant index
#     map -> DMA'd once per core), sliced in-kernel with pl.ds.
#   * f32 output      : accumulate directly into o_ref (no scratch).
#   * bf16 output     : f32 VMEM scratch accumulator, cast in epilogue.
# ---------------------------------------------------------------------------
def _gcn_aggregate_kernel(a_ref, h_ref, b_ref, o_ref, *scratch,
                          apply_relu, resident_h, tk):
    k = pl.program_id(1)
    acc_ref = scratch[0] if scratch else o_ref

    @pl.when(k == 0)
    def _():
        acc_ref[...] = jnp.zeros_like(acc_ref)

    if resident_h:
        start = pl.multiple_of(k * tk, tk)
        h_blk = h_ref[pl.ds(start, tk), :]
    else:
        h_blk = h_ref[...]

    acc_ref[...] += jnp.dot(a_ref[...], h_blk, preferred_element_type=jnp.float32)

    @pl.when(k == pl.num_programs(1) - 1)
    def _():
        y = acc_ref[...] + b_ref[...]          # bias only in the epilogue
        if apply_relu:
            y = jnp.maximum(y, 0.0)
        o_ref[...] = y.astype(o_ref.dtype)


def gcn_aggregate(a_hat_bf16, h_bf16, b_pad, *, apply_relu, tm, tk,
                  out_dtype, resident_h, vmem_limit):
    n_pad = a_hat_bf16.shape[0]
    out_p = h_bf16.shape[1]
    b2d = b_pad.reshape(1, out_p).astype(jnp.float32)

    if resident_h:
        # Constant index map -> H DMA'd into VMEM once and reused for all (i, k).
        h_spec = pl.BlockSpec((n_pad, out_p), lambda i, k: (0, 0))
    else:
        h_spec = pl.BlockSpec((tk, out_p), lambda i, k: (k, 0))

    acc_in_out = (out_dtype == jnp.float32)
    scratch_shapes = [] if acc_in_out else [pltpu.VMEM((tm, out_p), jnp.float32)]

    kernel = functools.partial(_gcn_aggregate_kernel, apply_relu=apply_relu,
                               resident_h=resident_h, tk=tk)
    return pl.pallas_call(
        kernel,
        out_shape=jax.ShapeDtypeStruct((n_pad, out_p), out_dtype),
        grid=(n_pad // tm, n_pad // tk),
        in_specs=[
            pl.BlockSpec((tm, tk), lambda i, k: (i, k)),      # A_hat row/col tile
            h_spec,                                           # H (resident or tiled)
            pl.BlockSpec((1, out_p), lambda i, k: (0, 0)),    # bias (resident)
        ],
        out_specs=pl.BlockSpec((tm, out_p), lambda i, k: (i, 0)),
        scratch_shapes=scratch_shapes,
        compiler_params=pltpu.CompilerParams(
            dimension_semantics=("parallel", "arbitrary"),
            vmem_limit_bytes=vmem_limit,
        ),
    )(a_hat_bf16, h_bf16, b2d)


# ---------------------------------------------------------------------------
# Dense GCN normalization at padded size: D^-1/2 (A + I) D^-1/2 (PyG gcn_norm).
# Built once per graph, cast straight to bf16 (both layers reuse it).
# Padded (>= num_nodes) rows/cols stay exactly zero (no self loops added there).
# ---------------------------------------------------------------------------
def normalized_adjacency_padded(edge_index, num_nodes, n_pad):
    src = edge_index[0]
    dst = edge_index[1]
    a = jnp.zeros((n_pad, n_pad), jnp.float32)
    # message flows src -> dst: row = target, col = source; scatter-add keeps
    # parallel-edge multiplicity like PyG's scatter.
    a = a.at[dst, src].add(1.0)
    # add_remaining_self_loops (fill value 1): only real nodes without a self loop.
    diag = jnp.diagonal(a)
    needs_loop = (diag <= 0.0) & (jnp.arange(n_pad) < num_nodes)
    a = a + jnp.diag(jnp.where(needs_loop, 1.0, 0.0))
    deg = a.sum(axis=1)
    d_inv_sqrt = jnp.where(deg > 0, jax.lax.rsqrt(deg), 0.0)
    return (d_inv_sqrt[:, None] * a * d_inv_sqrt[None, :]).astype(jnp.bfloat16)


# ---------------------------------------------------------------------------
# Full forward
# ---------------------------------------------------------------------------
def gcn_forward(x, edge_index, params, *, tm_pref=512, tk_pref=None):
    n, f = x.shape
    hidden = params["w1"].shape[1]
    classes = params["w2"].shape[1]

    # Generation-aware knobs (v7x: 64 MiB VMEM -> 48 MiB limit, tk<=2048, H<=16 MiB;
    # v5e/v6e: 128 MiB VMEM -> 96 MiB limit, tk<=4096, H<=32 MiB).
    vmem_cap = _vmem_capacity_bytes()
    vmem_limit = int(min(100 * _MIB, (vmem_cap * 3) // 4))
    if tk_pref is None:
        tk_pref = 4096 if vmem_cap > 64 * _MIB else 2048
    resident_cap = 32 * _MIB if vmem_cap > 64 * _MIB else 16 * _MIB

    # Pad node dim to a multiple of the row-tile target (not just 128) so tiles
    # never collapse; pad feature/output dims to lane width (128).
    n_pad = _round_up(n, min(tm_pref, 512))
    f_pad = _round_up(f, LANE)
    hid_pad = _round_up(hidden, LANE)
    cls_pad = _round_up(classes, LANE)

    tm = _pick_tile(n_pad, tm_pref)
    while n_pad // tm < 2 and tm > LANE:   # keep >=2 row tiles for v7x's 2 TCs
        tm //= 2
    tk = _pick_tile(n_pad, tk_pref)

    # A_hat built once per graph at padded size, bf16 (reused by both layers).
    a_p = normalized_adjacency_padded(edge_index, n, n_pad)

    # Wrapper-side padding + bf16 cast (MXU runs bf16, accumulation stays f32).
    x_p = jnp.zeros((n_pad, f_pad), jnp.bfloat16).at[:n, :f].set(
        x.astype(jnp.bfloat16))
    w1_p = jnp.zeros((f_pad, hid_pad), jnp.bfloat16).at[:f, :hidden].set(
        params["w1"].astype(jnp.bfloat16))
    b1_p = jnp.zeros((hid_pad,), jnp.float32).at[:hidden].set(params["b1"])
    w2_p = jnp.zeros((hid_pad, cls_pad), jnp.bfloat16).at[:hidden, :classes].set(
        params["w2"].astype(jnp.bfloat16))
    b2_p = jnp.zeros((cls_pad,), jnp.float32).at[:classes].set(params["b2"])

    resident1 = n_pad * hid_pad * 2 <= resident_cap
    resident2 = n_pad * cls_pad * 2 <= resident_cap

    # Layer 1: H1 = X @ W1 ; Y1 = ReLU(A_hat @ H1 + b1)
    # NOTE: padded rows of y1 equal ReLU(b1); they are dropped by the final slice
    # and the matching A_hat columns are zero, so they never affect real outputs.
    h1 = feature_transform(x_p, w1_p, tm=tm, vmem_limit=vmem_limit)
    y1 = gcn_aggregate(a_p, h1, b1_p, apply_relu=True, tm=tm, tk=tk,
                       out_dtype=jnp.bfloat16, resident_h=resident1,
                       vmem_limit=vmem_limit)

    # Dropout: identity in eval mode.
    # TODO(synk): training-mode dropout mask via pltpu.prng_random_bits.

    # Layer 2: H2 = Y1 @ W2 ; Y2 = A_hat @ H2 + b2  (accumulated directly in f32 out)
    h2 = feature_transform(y1, w2_p, tm=tm, vmem_limit=vmem_limit)
    y2 = gcn_aggregate(a_p, h2, b2_p, apply_relu=False, tm=tm, tk=tk,
                       out_dtype=jnp.float32, resident_h=resident2,
                       vmem_limit=vmem_limit)

    return y2[:n, :classes]


def init_params(key, num_features, num_classes, hidden=128):
    k1, k2 = jax.random.split(key)
    w1 = jax.random.normal(k1, (num_features, hidden), jnp.float32) * jnp.sqrt(
        2.0 / (num_features + hidden))
    w2 = jax.random.normal(k2, (hidden, num_classes), jnp.float32) * jnp.sqrt(
        2.0 / (hidden + num_classes))
    return {
        "w1": w1,
        "b1": jnp.zeros((hidden,), jnp.float32),
        "w2": w2,
        "b2": jnp.zeros((num_classes,), jnp.float32),
    }


if __name__ == "__main__":
    key = jax.random.PRNGKey(0)
    k_x, k_e, k_p = jax.random.split(key, 3)

    num_nodes = 16
    num_features = 32
    num_classes = 8
    num_edges = 40

    x = jax.random.normal(k_x, (num_nodes, num_features), jnp.float32)
    edge_index = jax.random.randint(k_e, (2, num_edges), 0, num_nodes,
                                    dtype=jnp.int32)
    params = init_params(k_p, num_features, num_classes)

    fwd = jax.jit(gcn_forward)
    out = fwd(x, edge_index, params)
    out = jax.block_until_ready(out)

    assert out.shape == (num_nodes, num_classes)
    assert jnp.all(jnp.isfinite(out))
    print("KERNEL_OK")
</pallas_src>

<mosaic_0001>
module attributes {stable_mosaic.version = 11 : i64} {
  func.func @_feature_transform_kernel(%arg0: i32, %arg1: memref<256x128xbf16, #tpu.memory_space<vmem>>, %arg2: memref<128x128xbf16, #tpu.memory_space<vmem>>, %arg3: memref<256x128xbf16, #tpu.memory_space<vmem>>) attributes {dimension_semantics = [#tpu.dimension_semantics<parallel>], iteration_bounds = array<i64: 2>, scalar_prefetch = 0 : i64, scratch_operands = 0 : i64, tpu.core_type = #tpu.core_type<tc>, window_params = [{transform_indices = @transform_0, window_bounds = array<i64: 256, 128>}, {pipeline_mode = #tpu.pipeline_mode<synchronous>, transform_indices = @transform_1, window_bounds = array<i64: 128, 128>}, {transform_indices = @transform_2, window_bounds = array<i64: 256, 128>}]} {
    %c0 = arith.constant 0 : index
    %c0_0 = arith.constant 0 : index
    %0 = vector.load %arg1[%c0, %c0_0] : memref<256x128xbf16, #tpu.memory_space<vmem>>, vector<256x128xbf16>
    %c0_1 = arith.constant 0 : index
    %c0_2 = arith.constant 0 : index
    %1 = vector.load %arg2[%c0_1, %c0_2] : memref<128x128xbf16, #tpu.memory_space<vmem>>, vector<128x128xbf16>
    %cst = arith.constant dense<0.000000e+00> : vector<256x128xf32>
    %2 = tpu.matmul %0, %1, %cst {dimension_numbers = #tpu.dot_dimension_numbers<[1], [0], [0], [1], [0, 0, 1, 1], [], []>} : vector<256x128xbf16>, vector<128x128xbf16>, vector<256x128xf32> -> vector<256x128xf32>
    %3 = arith.truncf %2 : vector<256x128xf32> to vector<256x128xbf16>
    %c0_3 = arith.constant 0 : index
    %c0_4 = arith.constant 0 : index
    %4 = vector.load %arg3[%c0_3, %c0_4] : memref<256x128xbf16, #tpu.memory_space<vmem>>, vector<256x128xbf16>
    tpu.vector_store %arg3[%c0_3, %c0_4], %3 {strides = array<i32>} : memref<256x128xbf16, #tpu.memory_space<vmem>>, vector<256x128xbf16>,
    return
  }
  func.func @transform_0(%arg0: i32) -> (i32, i32) {
    %c0_i32 = arith.constant 0 : i32
    %c0_i32_0 = arith.constant 0 : i32
    return %arg0, %c0_i32 : i32, i32
  }
  func.func @transform_1(%arg0: i32) -> (i32, i32) {
    %c0_i32 = arith.constant 0 : i32
    %c0_i32_0 = arith.constant 0 : i32
    %c0_i32_1 = arith.constant 0 : i32
    return %c0_i32, %c0_i32_0 : i32, i32
  }
  func.func @transform_2(%arg0: i32) -> (i32, i32) {
    %c0_i32 = arith.constant 0 : i32
    %c0_i32_0 = arith.constant 0 : i32
    return %arg0, %c0_i32 : i32, i32
  }
}

module attributes {stable_mosaic.version = 11 : i64} {
  func.func @_gcn_aggregate_kernel(%arg0: i32, %arg1: i32, %arg2: memref<256x512xbf16, #tpu.memory_space<vmem>>, %arg3: memref<512x128xbf16, #tpu.memory_space<vmem>>, %arg4: memref<1x128xf32, #tpu.memory_space<vmem>>, %arg5: memref<256x128xbf16, #tpu.memory_space<vmem>>, %arg6: memref<256x128xf32, #tpu.memory_space<vmem>>) attributes {dimension_semantics = [#tpu.dimension_semantics<parallel>, #tpu.dimension_semantics<arbitrary>], iteration_bounds = array<i64: 2, 1>, scalar_prefetch = 0 : i64, scratch_operands = 1 : i64, tpu.core_type = #tpu.core_type<tc>, window_params = [{transform_indices = @transform_0, window_bounds = array<i64: 256, 512>}, {pipeline_mode = #tpu.pipeline_mode<synchronous>, transform_indices = @transform_1, window_bounds = array<i64: 512, 128>}, {pipeline_mode = #tpu.pipeline_mode<synchronous>, transform_indices = @transform_2, window_bounds = array<i64: 1, 128>}, {transform_indices = @transform_3, window_bounds = array<i64: 256, 128>}]} {
    %c0_i32 = arith.constant 0 : i32
    %0 = arith.cmpi eq, %arg1, %c0_i32 : i32
    %1 = arith.extui %0 : i1 to i32
    %c0_i32_0 = arith.constant 0 : i32
    %2 = arith.cmpi ne, %1, %c0_i32_0 : i32
    scf.if %2 {
      %cst_9 = arith.constant 0.000000e+00 : f32
      %15 = vector.broadcast %cst_9 : f32 to vector<256x128xf32>
      %c0_10 = arith.constant 0 : index
      %c0_11 = arith.constant 0 : index
      %16 = vector.load %arg6[%c0_10, %c0_11] : memref<256x128xf32, #tpu.memory_space<vmem>>, vector<256x128xf32>
      tpu.vector_store %arg6[%c0_10, %c0_11], %15 {strides = array<i32>} : memref<256x128xf32, #tpu.memory_space<vmem>>, vector<256x128xf32>,
    } else {
    }
    %c512_i32 = arith.constant 512 : i32
    %3 = arith.muli %arg1, %c512_i32 : i32
    %4 = tpu.assume_multiple %3, 512 : i32
    %5 = arith.index_cast %4 : i32 to index
    %c0 = arith.constant 0 : index
    %6 = vector.load %arg3[%5, %c0] : memref<512x128xbf16, #tpu.memory_space<vmem>>, vector<512x128xbf16>
    %c0_1 = arith.constant 0 : index
    %c0_2 = arith.constant 0 : index
    %7 = vector.load %arg6[%c0_1, %c0_2] : memref<256x128xf32, #tpu.memory_space<vmem>>, vector<256x128xf32>
    %c0_3 = arith.constant 0 : index
    %c0_4 = arith.constant 0 : index
    %8 = vector.load %arg2[%c0_3, %c0_4] : memref<256x512xbf16, #tpu.memory_space<vmem>>, vector<256x512xbf16>
    %cst = arith.constant dense<0.000000e+00> : vector<256x128xf32>
    %9 = tpu.matmul %8, %6, %cst {dimension_numbers = #tpu.dot_dimension_numbers<[1], [0], [0], [1], [0, 0, 1, 1], [], []>} : vector<256x512xbf16>, vector<512x128xbf16>, vector<256x128xf32> -> vector<256x128xf32>
    %10 = arith.addf %7, %9 : vector<256x128xf32>
    %c0_5 = arith.constant 0 : index
    %c0_6 = arith.constant 0 : index
    %11 = vector.load %arg6[%c0_5, %c0_6] : memref<256x128xf32, #tpu.memory_space<vmem>>, vector<256x128xf32>
    tpu.vector_store %arg6[%c0_5, %c0_6], %10 {strides = array<i32>} : memref<256x128xf32, #tpu.memory_space<vmem>>, vector<256x128xf32>,
    %c0_i32_7 = arith.constant 0 : i32
    %12 = arith.cmpi eq, %arg1, %c0_i32_7 : i32
    %13 = arith.extui %12 : i1 to i32
    %c0_i32_8 = arith.constant 0 : i32
    %14 = arith.cmpi ne, %13, %c0_i32_8 : i32
    scf.if %14 {
      %c0_9 = arith.constant 0 : index
      %c0_10 = arith.constant 0 : index
      %15 = vector.load %arg6[%c0_9, %c0_10] : memref<256x128xf32, #tpu.memory_space<vmem>>, vector<256x128xf32>
      %c0_11 = arith.constant 0 : index
      %c0_12 = arith.constant 0 : index
      %16 = vector.load %arg4[%c0_11, %c0_12] : memref<1x128xf32, #tpu.memory_space<vmem>>, vector<1x128xf32>
      %17 = vector.broadcast %16 : vector<1x128xf32> to vector<256x128xf32>
      %18 = arith.addf %15, %17 : vector<256x128xf32>
      %cst_13 = arith.constant 0.000000e+00 : f32
      %19 = vector.broadcast %cst_13 : f32 to vector<256x128xf32>
      %20 = arith.maximumf %18, %19 : vector<256x128xf32>
      %21 = arith.truncf %20 : vector<256x128xf32> to vector<256x128xbf16>
      %c0_14 = arith.constant 0 : index
      %c0_15 = arith.constant 0 : index
      %22 = vector.load %arg5[%c0_14, %c0_15] : memref<256x128xbf16, #tpu.memory_space<vmem>>, vector<256x128xbf16>
      tpu.vector_store %arg5[%c0_14, %c0_15], %21 {strides = array<i32>} : memref<256x128xbf16, #tpu.memory_space<vmem>>, vector<256x128xbf16>,
    } else {
    }
    return
  }
  func.func @transform_0(%arg0: i32, %arg1: i32) -> (i32, i32) {
    %c0_i32 = arith.constant 0 : i32
    return %arg0, %arg1 : i32, i32
  }
  func.func @transform_1(%arg0: i32, %arg1: i32) -> (i32, i32) {
    %c0_i32 = arith.constant 0 : i32
    %c0_i32_0 = arith.constant 0 : i32
    %c0_i32_1 = arith.constant 0 : i32
    return %c0_i32, %c0_i32_0 : i32, i32
  }
  func.func @transform_2(%arg0: i32, %arg1: i32) -> (i32, i32) {
    %c0_i32 = arith.constant 0 : i32
    %c0_i32_0 = arith.constant 0 : i32
    %c0_i32_1 = arith.constant 0 : i32
    return %c0_i32, %c0_i32_0 : i32, i32
  }
  func.func @transform_3(%arg0: i32, %arg1: i32) -> (i32, i32) {
    %c0_i32 = arith.constant 0 : i32
    %c0_i32_0 = arith.constant 0 : i32
    return %arg0, %c0_i32 : i32, i32
  }
}

module attributes {stable_mosaic.version = 11 : i64} {
  func.func @_gcn_aggregate_kernel(%arg0: i32, %arg1: i32, %arg2: memref<256x512xbf16, #tpu.memory_space<vmem>>, %arg3: memref<512x128xbf16, #tpu.memory_space<vmem>>, %arg4: memref<1x128xf32, #tpu.memory_space<vmem>>, %arg5: memref<256x128xf32, #tpu.memory_space<vmem>>) attributes {dimension_semantics = [#tpu.dimension_semantics<parallel>, #tpu.dimension_semantics<arbitrary>], iteration_bounds = array<i64: 2, 1>, scalar_prefetch = 0 : i64, scratch_operands = 0 : i64, tpu.core_type = #tpu.core_type<tc>, window_params = [{transform_indices = @transform_0, window_bounds = array<i64: 256, 512>}, {pipeline_mode = #tpu.pipeline_mode<synchronous>, transform_indices = @transform_1, window_bounds = array<i64: 512, 128>}, {pipeline_mode = #tpu.pipeline_mode<synchronous>, transform_indices = @transform_2, window_bounds = array<i64: 1, 128>}, {transform_indices = @transform_3, window_bounds = array<i64: 256, 128>}]} {
    %c0_i32 = arith.constant 0 : i32
    %0 = arith.cmpi eq, %arg1, %c0_i32 : i32
    %1 = arith.extui %0 : i1 to i32
    %c0_i32_0 = arith.constant 0 : i32
    %2 = arith.cmpi ne, %1, %c0_i32_0 : i32
    scf.if %2 {
      %cst_9 = arith.constant 0.000000e+00 : f32
      %15 = vector.broadcast %cst_9 : f32 to vector<256x128xf32>
      %c0_10 = arith.constant 0 : index
      %c0_11 = arith.constant 0 : index
      %16 = vector.load %arg5[%c0_10, %c0_11] : memref<256x128xf32, #tpu.memory_space<vmem>>, vector<256x128xf32>
      tpu.vector_store %arg5[%c0_10, %c0_11], %15 {strides = array<i32>} : memref<256x128xf32, #tpu.memory_space<vmem>>, vector<256x128xf32>,
    } else {
    }
    %c512_i32 = arith.constant 512 : i32
    %3 = arith.muli %arg1, %c512_i32 : i32
    %4 = tpu.assume_multiple %3, 512 : i32
    %5 = arith.index_cast %4 : i32 to index
    %c0 = arith.constant 0 : index
    %6 = vector.load %arg3[%5, %c0] : memref<512x128xbf16, #tpu.memory_space<vmem>>, vector<512x128xbf16>
    %c0_1 = arith.constant 0 : index
    %c0_2 = arith.constant 0 : index
    %7 = vector.load %arg5[%c0_1, %c0_2] : memref<256x128xf32, #tpu.memory_space<vmem>>, vector<256x128xf32>
    %c0_3 = arith.constant 0 : index
    %c0_4 = arith.constant 0 : index
    %8 = vector.load %arg2[%c0_3, %c0_4] : memref<256x512xbf16, #tpu.memory_space<vmem>>, vector<256x512xbf16>
    %cst = arith.constant dense<0.000000e+00> : vector<256x128xf32>
    %9 = tpu.matmul %8, %6, %cst {dimension_numbers = #tpu.dot_dimension_numbers<[1], [0], [0], [1], [0, 0, 1, 1], [], []>} : vector<256x512xbf16>, vector<512x128xbf16>, vector<256x128xf32> -> vector<256x128xf32>
    %10 = arith.addf %7, %9 : vector<256x128xf32>
    %c0_5 = arith.constant 0 : index
    %c0_6 = arith.constant 0 : index
    %11 = vector.load %arg5[%c0_5, %c0_6] : memref<256x128xf32, #tpu.memory_space<vmem>>, vector<256x128xf32>
    tpu.vector_store %arg5[%c0_5, %c0_6], %10 {strides = array<i32>} : memref<256x128xf32, #tpu.memory_space<vmem>>, vector<256x128xf32>,
    %c0_i32_7 = arith.constant 0 : i32
    %12 = arith.cmpi eq, %arg1, %c0_i32_7 : i32
    %13 = arith.extui %12 : i1 to i32
    %c0_i32_8 = arith.constant 0 : i32
    %14 = arith.cmpi ne, %13, %c0_i32_8 : i32
    scf.if %14 {
      %c0_9 = arith.constant 0 : index
      %c0_10 = arith.constant 0 : index
      %15 = vector.load %arg5[%c0_9, %c0_10] : memref<256x128xf32, #tpu.memory_space<vmem>>, vector<256x128xf32>
      %c0_11 = arith.constant 0 : index
      %c0_12 = arith.constant 0 : index
      %16 = vector.load %arg4[%c0_11, %c0_12] : memref<1x128xf32, #tpu.memory_space<vmem>>, vector<1x128xf32>
      %17 = vector.broadcast %16 : vector<1x128xf32> to vector<256x128xf32>
      %18 = arith.addf %15, %17 : vector<256x128xf32>
      %c0_13 = arith.constant 0 : index
      %c0_14 = arith.constant 0 : index
      %19 = vector.load %arg5[%c0_13, %c0_14] : memref<256x128xf32, #tpu.memory_space<vmem>>, vector<256x128xf32>
      tpu.vector_store %arg5[%c0_13, %c0_14], %18 {strides = array<i32>} : memref<256x128xf32, #tpu.memory_space<vmem>>, vector<256x128xf32>,
    } else {
    }
    return
  }
  func.func @transform_0(%arg0: i32, %arg1: i32) -> (i32, i32) {
    %c0_i32 = arith.constant 0 : i32
    return %arg0, %arg1 : i32, i32
  }
  func.func @transform_1(%arg0: i32, %arg1: i32) -> (i32, i32) {
    %c0_i32 = arith.constant 0 : i32
    %c0_i32_0 = arith.constant 0 : i32
    %c0_i32_1 = arith.constant 0 : i32
    return %c0_i32, %c0_i32_0 : i32, i32
  }
  func.func @transform_2(%arg0: i32, %arg1: i32) -> (i32, i32) {
    %c0_i32 = arith.constant 0 : i32
    %c0_i32_0 = arith.constant 0 : i32
    %c0_i32_1 = arith.constant 0 : i32
    return %c0_i32, %c0_i32_0 : i32, i32
  }
  func.func @transform_3(%arg0: i32, %arg1: i32) -> (i32, i32) {
    %c0_i32 = arith.constant 0 : i32
    %c0_i32_0 = arith.constant 0 : i32
    return %arg0, %c0_i32 : i32, i32
  }
}

</mosaic_0001>

<bundles_post_ra>
// kernel: gcn_forward.4
= control target key start
LH: loop header
LB: loop body
LE: loop exit
PB: predicated region body
PF: predicated region fallthrough
CT: control target
= control target key end

     0   :  { %s829_s9 = smov 0   ;;  %s913_s0 = inlined_call_operand.vmem [shape: bf16[512,128], index: 0, kind: input, shape index: {}]   ;;  %s914_s1 = inlined_call_operand.vmem [shape: bf16[128,128], index: 1, kind: input, shape index: {}]   ;;  %s915_s2 = inlined_call_operand.vmem [shape: bf16[512,128], index: 2, kind: output, shape index: {}]  }
   0x1 LB: > { %s548_s10 = sadd.s32 4294967295, %s812_s9   ;;  %p552_p0 = scmp.ge.s32.totalorder %s812_s9, 1  ;;  %s812_s9 = sphi %s829_s9, %s12_s9  }
   0x2   : > { %p113_p1 = scmp.lt.s32.totalorder %s812_s9, 3 }
   0x4   : > { %p114_p2 = pnand %p552_p0, %p113_p1 }
   0x5   : > { %s553_s19 = sshll.u32 (!%p114_p2), %s548_s10, 5 }
   0x6   : > { %117 = sbr.rel (%p114_p2) target bundleno = 236 (0xec), region = 28  ;;  %p136_p3 = scmp.lt.s32.totalorder (!%p114_p2), %s553_s19, 63 }
   0xb   : > { %v678_v0 = vld [vmem:[%s914_s1 + $0x38] sm:$0xff]  ;;  %v677_v1 = vld [vmem:[%s914_s1 + $0x30] sm:$0xff]  ;;  %v676_v2 = vld [vmem:[%s914_s1 + $0x28] sm:$0xff]  ;;  %s917_s19 = smov (!%p136_p3, %s553_s19), 63 }
   0xc   : > { %339 = vmatpush.bf16.msra.mxu0 %v678_v0  ;;  %774 = vmatpush.bf16.msra.mxu1 %v678_v0  ;;  %v675_v3 = vld [vmem:[%s914_s1 + $0x20] sm:$0xff]  ;;  %v674_v4 = vld [vmem:[%s914_s1 + $0x18] sm:$0xff]  ;;  %v673_v5 = vld [vmem:[%s914_s1 + $0x10] sm:$0xff]  ;;  %s554_s26 = sshll.u32 %s917_s19, 2 }
   0xd   : > { %775 = vmatpush.bf16.msra.mxu2 %v678_v0  ;;  %776 = vmatpush.bf16.msra.mxu3 %v678_v0  ;;  %v672_v6 = vld [vmem:[%s914_s1 + $0x8] sm:$0xff]  ;;  %v671_v7 = vld [vmem:[%s914_s1] sm:$0xff]  ;;  %s869_s3 = scalar_lea.vmem %s913_s0, %s554_s26  ;;  %s892_s6 = scalar_lea.vmem %s915_s2, %s554_s26 }
   0xe   : > { %v655_v8 = vld [vmem:[%s869_s3] sm:$0xff]  ;;  %v656_v12 = vld [vmem:[%s869_s3 + $0x8] sm:$0xff]  ;;  %v657_v16 = vld [vmem:[%s869_s3 + $0x10] sm:$0xff] }
   0xf   : > { %v659_v9 = vld [vmem:[%s869_s3 + $0x20] sm:$0xff]  ;;  %v660_v13 = vld [vmem:[%s869_s3 + $0x28] sm:$0xff]  ;;  %v661_v17 = vld [vmem:[%s869_s3 + $0x30] sm:$0xff] }
  0x10   : > { %340 = vmatpush.bf16.msra.mxu0 %v677_v1  ;;  %777 = vmatpush.bf16.msra.mxu1 %v677_v1  ;;  %v663_v10 = vld [vmem:[%s869_s3 + $0x40] sm:$0xff]  ;;  %v664_v14 = vld [vmem:[%s869_s3 + $0x48] sm:$0xff]  ;;  %v665_v18 = vld [vmem:[%s869_s3 + $0x50] sm:$0xff] }
  0x11   : > { %778 = vmatpush.bf16.msra.mxu2 %v677_v1  ;;  %779 = vmatpush.bf16.msra.mxu3 %v677_v1  ;;  %v667_v11 = vld [vmem:[%s869_s3 + $0x60] sm:$0xff]  ;;  %v668_v15 = vld [vmem:[%s869_s3 + $0x68] sm:$0xff]  ;;  %v669_v19 = vld [vmem:[%s869_s3 + $0x70] sm:$0xff] }
  0x12   : > { %v658_v20 = vld [vmem:[%s869_s3 + $0x18] sm:$0xff] }
  0x13   : > { %v662_v21 = vld [vmem:[%s869_s3 + $0x38] sm:$0xff] }
  0x14   : > { %341 = vmatpush.bf16.msra.mxu0 %v676_v2  ;;  %780 = vmatpush.bf16.msra.mxu1 %v676_v2  ;;  %v666_v22 = vld [vmem:[%s869_s3 + $0x58] sm:$0xff] }
  0x15   : > { %781 = vmatpush.bf16.msra.mxu2 %v676_v2  ;;  %782 = vmatpush.bf16.msra.mxu3 %v676_v2  ;;  %v670_v23 = vld [vmem:[%s869_s3 + $0x78] sm:$0xff] }
  0x18   : > { %342 = vmatpush.bf16.msra.mxu0 %v675_v3  ;;  %783 = vmatpush.bf16.msra.mxu1 %v675_v3 }
  0x19   : > { %784 = vmatpush.bf16.msra.mxu2 %v675_v3  ;;  %785 = vmatpush.bf16.msra.mxu3 %v675_v3 }
  0x1c   : > { %343 = vmatpush.bf16.msra.mxu0 %v674_v4  ;;  %786 = vmatpush.bf16.msra.mxu1 %v674_v4 }
  0x1d   : > { %787 = vmatpush.bf16.msra.mxu2 %v674_v4  ;;  %788 = vmatpush.bf16.msra.mxu3 %v674_v4 }
  0x20   : > { %344 = vmatpush.bf16.msra.mxu0 %v673_v5  ;;  %789 = vmatpush.bf16.msra.mxu1 %v673_v5 }
  0x21   : > { %790 = vmatpush.bf16.msra.mxu2 %v673_v5  ;;  %791 = vmatpush.bf16.msra.mxu3 %v673_v5 }
  0x24   : > { %345 = vmatpush.bf16.msra.mxu0 %v672_v6  ;;  %792 = vmatpush.bf16.msra.mxu1 %v672_v6 }
  0x25   : > { %793 = vmatpush.bf16.msra.mxu2 %v672_v6  ;;  %794 = vmatpush.bf16.msra.mxu3 %v672_v6 }
  0x28   : > { %346 = vmatpush.bf16.msra.mxu0 %v671_v7  ;;  %795 = vmatpush.bf16.msra.mxu1 %v671_v7 }
  0x29   : > { %796 = vmatpush.bf16.msra.mxu2 %v671_v7  ;;  %797 = vmatpush.bf16.msra.mxu3 %v671_v7 }
  0x2b   : > { %347 = vmatmul.bf16.vlgmr.msra.gmra.mxu0 %v655_v8  ;;  %367 = vmatmul.bf16.vlgmr.msra.gmra.mxu1 %v659_v9 }
  0x2c   : > { %387 = vmatmul.bf16.vlgmr.msra.gmra.mxu2 %v663_v10  ;;  %407 = vmatmul.bf16.vlgmr.msra.gmra.mxu3 %v667_v11 }
  0x3b   : > { %352 = vmatmul.bf16.gmra.mxu0 %v656_v12  ;;  %372 = vmatmul.bf16.gmra.mxu1 %v660_v13 }
  0x3c   : > { %392 = vmatmul.bf16.gmra.mxu2 %v664_v14  ;;  %412 = vmatmul.bf16.gmra.mxu3 %v668_v15 }
  0x4b   : > { %357 = vmatmul.bf16.gmra.mxu0 %v657_v16  ;;  %377 = vmatmul.bf16.gmra.mxu1 %v661_v17 }
  0x4c   : > { %397 = vmatmul.bf16.gmra.mxu2 %v665_v18  ;;  %417 = vmatmul.bf16.gmra.mxu3 %v669_v19 }
  0x5b   : > { %362 = vmatmul.bf16.gmra.mxu0 %v658_v20  ;;  %382 = vmatmul.bf16.gmra.mxu1 %v662_v21 }
  0x5c   : > { %402 = vmatmul.bf16.gmra.mxu2 %v666_v22  ;;  %422 = vmatmul.bf16.gmra.mxu3 %v670_v23 }
  0xa8   : > { %v348_v24 = vpop.f32.mrf.mxu0  ;;  %v368_v25 = vpop.f32.mrf.mxu1 }
  0xaf   : > { %v388_v26 = vpop.f32.mrf.mxu2  ;;  %v408_v27 = vpop.f32.mrf.mxu3 }
  0xb0   : > { %v350_v28 = vpop.f32.mrf.mxu0  ;;  %v370_v29 = vpop.f32.mrf.mxu1 }
  0xb1   : > { %v682_v30 = vpack.c.bf16 %v350_v28, %v348_v24  ;;  %v702_v31 = vpack.c.bf16 %v370_v29, %v368_v25 }
  0xb3   : > { %683 = vst [vmem:[%s892_s6] sm:$0xff] %v682_v30  }
  0xb4   : > { %762 = vst [vmem:[%s892_s6 + $0x20] sm:$0xff] %v702_v31  }
  0xb7   : > { %v390_v32 = vpop.f32.mrf.mxu2  ;;  %v410_v33 = vpop.f32.mrf.mxu3 }
  0xb8   : > { %v722_v34 = vpack.c.bf16 %v390_v32, %v388_v26  ;;  %v742_v35 = vpack.c.bf16 %v410_v33, %v408_v27  ;;  %v353_v36 = vpop.f32.mrf.mxu0  ;;  %v373_v37 = vpop.f32.mrf.mxu1 }
  0xba   : > { %766 = vst [vmem:[%s892_s6 + $0x40] sm:$0xff] %v722_v34  }
  0xbb   : > { %770 = vst [vmem:[%s892_s6 + $0x60] sm:$0xff] %v742_v35  }
  0xbf   : > { %v393_v38 = vpop.f32.mrf.mxu2  ;;  %v413_v39 = vpop.f32.mrf.mxu3 }
  0xc0   : > { %v355_v40 = vpop.f32.mrf.mxu0  ;;  %v375_v41 = vpop.f32.mrf.mxu1 }
  0xc1   : > { %v687_v42 = vpack.c.bf16 %v355_v40, %v353_v36  ;;  %v707_v43 = vpack.c.bf16 %v375_v41, %v373_v37 }
  0xc3   : > { %759 = vst [vmem:[%s892_s6 + $0x8] sm:$0xff] %v687_v42  }
  0xc4   : > { %763 = vst [vmem:[%s892_s6 + $0x28] sm:$0xff] %v707_v43  }
  0xc7   : > { %v395_v44 = vpop.f32.mrf.mxu2  ;;  %v415_v45 = vpop.f32.mrf.mxu3 }
  0xc8   : > { %v727_v46 = vpack.c.bf16 %v395_v44, %v393_v38  ;;  %v747_v47 = vpack.c.bf16 %v415_v45, %v413_v39  ;;  %v358_v48 = vpop.f32.mrf.mxu0  ;;  %v378_v49 = vpop.f32.mrf.mxu1 }
  0xca   : > { %767 = vst [vmem:[%s892_s6 + $0x48] sm:$0xff] %v727_v46  }
  0xcb   : > { %771 = vst [vmem:[%s892_s6 + $0x68] sm:$0xff] %v747_v47  }
  0xcf   : > { %v398_v50 = vpop.f32.mrf.mxu2  ;;  %v418_v51 = vpop.f32.mrf.mxu3 }
  0xd0   : > { %v360_v52 = vpop.f32.mrf.mxu0  ;;  %v380_v53 = vpop.f32.mrf.mxu1 }
  0xd1   : > { %v692_v54 = vpack.c.bf16 %v360_v52, %v358_v48  ;;  %v712_v55 = vpack.c.bf16 %v380_v53, %v378_v49 }
  0xd3   : > { %760 = vst [vmem:[%s892_s6 + $0x10] sm:$0xff] %v692_v54  }
  0xd4   : > { %764 = vst [vmem:[%s892_s6 + $0x30] sm:$0xff] %v712_v55  }
  0xd7   : > { %v400_v56 = vpop.f32.mrf.mxu2  ;;  %v420_v57 = vpop.f32.mrf.mxu3 }
  0xd8   : > { %v732_v58 = vpack.c.bf16 %v400_v56, %v398_v50  ;;  %v752_v59 = vpack.c.bf16 %v420_v57, %v418_v51  ;;  %v363_v60 = vpop.f32.mrf.mxu0  ;;  %v383_v61 = vpop.f32.mrf.mxu1 }
  0xda   : > { %768 = vst [vmem:[%s892_s6 + $0x50] sm:$0xff] %v732_v58  }
  0xdb   : > { %772 = vst [vmem:[%s892_s6 + $0x70] sm:$0xff] %v752_v59  }
  0xdf   : > { %v403_v62 = vpop.f32.mrf.mxu2  ;;  %v423_v63 = vpop.f32.mrf.mxu3 }
  0xe0   : > { %v365_v0 = vpop.f32.mrf.mxu0  ;;  %v385_v1 = vpop.f32.mrf.mxu1 }
  0xe1   : > { %v697_v2 = vpack.c.bf16 %v365_v0, %v363_v60  ;;  %v717_v3 = vpack.c.bf16 %v385_v1, %v383_v61 }
  0xe3   : > { %761 = vst [vmem:[%s892_s6 + $0x18] sm:$0xff] %v697_v2  }
  0xe4   : > { %765 = vst [vmem:[%s892_s6 + $0x38] sm:$0xff] %v717_v3  }
  0xe7   : > { %v405_v4 = vpop.f32.mrf.mxu2  ;;  %v425_v5 = vpop.f32.mrf.mxu3 }
  0xe8   : > { %v737_v6 = vpack.c.bf16 %v405_v4, %v403_v62  ;;  %v757_v7 = vpack.c.bf16 %v425_v5, %v423_v63 }
  0xea   : > { %769 = vst [vmem:[%s892_s6 + $0x58] sm:$0xff] %v737_v6  }
  0xeb   : > { %773 = vst [vmem:[%s892_s6 + $0x78] sm:$0xff] %v757_v7  }
  0xec PF: > { %s12_s9 = sadd.s32 1, %s812_s9  }
  0xed   : > { %p9_p4 = scmp.ge.s32.totalorder %s12_s9, 4  }
  0xef   :  { %11 = sbr.rel (!%p9_p4) target bundleno = 1 (0x1), region = 58 }

// kernel: gcn_forward.5
= control target key start
LH: loop header
LB: loop body
LE: loop exit
PB: predicated region body
PF: predicated region fallthrough
CT: control target
= control target key end

     0   :  { %s2235_s12 = smov 0   ;;  %s2237_s13 = smov 0   ;;  %s2556_s0 = inlined_call_operand.vmem [shape: bf16[512,512], index: 0, kind: input, shape index: {}]   ;;  %s2557_s1 = inlined_call_operand.vmem [shape: bf16[512,128], index: 1, kind: input, shape index: {}]   ;;  %s2558_s2 = inlined_call_operand.vmem [shape: f32[1,128], index: 2, kind: input, shape index: {}]   ;;  %s2559_s3 = inlined_call_operand.vmem [shape: bf16[512,128], index: 3, kind: output, shape index: {}]  }
   0x1   :  { %s2239_s14 = smov 0  }
   0x2 LB: > { %s25_s15 = sadd.s32 1, %s2209_s13  ;;  %p1582_p0 = scmp.ge.s32.totalorder %s2213_s14, 1  ;;  %s2213_s14 = sphi %s2239_s14, %s13_s14   ;;  %s2209_s13 = sphi %s2237_s13, %s2561_s13   ;;  %s2205_s12 = sphi %s2235_s12, %s2560_s12  }
   0x3   : > { %p27_p1 = scmp.ge.s32.totalorder %s25_s15, 2  ;;  %p158_p2 = scmp.lt.s32.totalorder %s2213_s14, 3 }
   0x5   : > { %s2563_s15 = smov (%p27_p1, %s25_s15), 0  ;;  %p159_p3 = pnand %p1582_p0, %p158_p2 }
   0x6   : > { %s1583_s17 = sshll.u32 (!%p159_p3), %s2205_s12, 5 }
   0x7   : > { %162 = sbr.rel (%p159_p3) target bundleno = 437 (0x1b5), region = 32  ;;  %p189_p4 = scmp.lt.s32.totalorder (!%p159_p3), %s1583_s17, 63 }
   0xc   : > { %v1982_v0 = vld [vmem:[%s2557_s1 + $0x38] sm:$0xff]  ;;  %v1981_v4 = vld [vmem:[%s2557_s1 + $0x30] sm:$0xff]  ;;  %v1980_v8 = vld [vmem:[%s2557_s1 + $0x28] sm:$0xff]  ;;  %s2565_s17 = smov (!%p189_p4, %s1583_s17), 63 }
   0xd   : > { %v1990_v1 = vld [vmem:[%s2557_s1 + $0x78] sm:$0xff]  ;;  %918 = vmatpush.bf16.msra.mxu0 %v1982_v0  ;;  %v1989_v5 = vld [vmem:[%s2557_s1 + $0x70] sm:$0xff]  ;;  %v1988_v9 = vld [vmem:[%s2557_s1 + $0x68] sm:$0xff]  ;;  %s1974_s19 = sshll.u32 %s2565_s17, 4  ;;  %s1587_s18 = sshll.u32 %s2565_s17, 2 }
   0xe   : > { %v1998_v2 = vld [vmem:[%s2557_s1 + $0xb8] sm:$0xff]  ;;  %1007 = vmatpush.bf16.msra.mxu1 %v1990_v1  ;;  %v1997_v6 = vld [vmem:[%s2557_s1 + $0xb0] sm:$0xff]  ;;  %v1996_v10 = vld [vmem:[%s2557_s1 + $0xa8] sm:$0xff]  ;;  %s2340_s12 = scalar_lea.vmem %s2556_s0, %s1974_s19  ;;  %s2451_s21 = scalar_lea.vmem %s2559_s3, %s1587_s18 }
   0xf   : > { %v2006_v3 = vld [vmem:[%s2557_s1 + $0xf8] sm:$0xff]  ;;  %1096 = vmatpush.bf16.msra.mxu2 %v1998_v2  ;;  %v2005_v7 = vld [vmem:[%s2557_s1 + $0xf0] sm:$0xff]  ;;  %v2004_v11 = vld [vmem:[%s2557_s1 + $0xe8] sm:$0xff] }
  0x10   : > { %1185 = vmatpush.bf16.msra.mxu3 %v2006_v3  ;;  %v1979_v12 = vld [vmem:[%s2557_s1 + $0x20] sm:$0xff]  ;;  %v1978_v16 = vld [vmem:[%s2557_s1 + $0x18] sm:$0xff]  ;;  %v1977_v20 = vld [vmem:[%s2557_s1 + $0x10] sm:$0xff] }
  0x11   : > { %919 = vmatpush.bf16.msra.mxu0 %v1981_v4  ;;  %v1987_v13 = vld [vmem:[%s2557_s1 + $0x60] sm:$0xff]  ;;  %v1986_v17 = vld [vmem:[%s2557_s1 + $0x58] sm:$0xff]  ;;  %v1985_v21 = vld [vmem:[%s2557_s1 + $0x50] sm:$0xff] }
  0x12   : > { %1008 = vmatpush.bf16.msra.mxu1 %v1989_v5  ;;  %v1995_v14 = vld [vmem:[%s2557_s1 + $0xa0] sm:$0xff]  ;;  %v1994_v18 = vld [vmem:[%s2557_s1 + $0x98] sm:$0xff]  ;;  %v1993_v22 = vld [vmem:[%s2557_s1 + $0x90] sm:$0xff] }
  0x13   : > { %1097 = vmatpush.bf16.msra.mxu2 %v1997_v6  ;;  %v2003_v15 = vld [vmem:[%s2557_s1 + $0xe0] sm:$0xff]  ;;  %v2002_v19 = vld [vmem:[%s2557_s1 + $0xd8] sm:$0xff]  ;;  %v2001_v23 = vld [vmem:[%s2557_s1 + $0xd0] sm:$0xff] }
  0x14   : > { %1186 = vmatpush.bf16.msra.mxu3 %v2005_v7  ;;  %v1976_v24 = vld [vmem:[%s2557_s1 + $0x8] sm:$0xff]  ;;  %v1975_v28 = vld [vmem:[%s2557_s1] sm:$0xff]  ;;  %v2009_v33 = vld [vmem:[%s2340_s12 + $0xc] sm:$0xf0] }
  0x15   : > { %920 = vmatpush.bf16.msra.mxu0 %v1980_v8  ;;  %v1984_v25 = vld [vmem:[%s2557_s1 + $0x48] sm:$0xff]  ;;  %v1983_v29 = vld [vmem:[%s2557_s1 + $0x40] sm:$0xff]  ;;  %v1592_v35 = vld [vmem:[%s2340_s12 + $0x10] sm:$0xf0] }
  0x16   : > { %1009 = vmatpush.bf16.msra.mxu1 %v1988_v9  ;;  %v1992_v26 = vld [vmem:[%s2557_s1 + $0x88] sm:$0xff]  ;;  %v1991_v30 = vld [vmem:[%s2557_s1 + $0x80] sm:$0xff]  ;;  %v2010_v37 = vld [vmem:[%s2340_s12 + $0x14] sm:$0xf0] }
  0x17   : > { %1098 = vmatpush.bf16.msra.mxu2 %v1996_v10  ;;  %v2000_v27 = vld [vmem:[%s2557_s1 + $0xc8] sm:$0xff]  ;;  %v1999_v31 = vld [vmem:[%s2557_s1 + $0xc0] sm:$0xff]  ;;  %v1600_v39 = vld [vmem:[%s2340_s12 + $0x18] sm:$0xf0] }
  0x18   : > { %1187 = vmatpush.bf16.msra.mxu3 %v2004_v11  ;;  %v1590_v32 = vld [vmem:[%s2340_s12] sm:$0xf]  ;;  %v2007_v34 = vld [vmem:[%s2340_s12 + $0x4] sm:$0xf]  ;;  %v1598_v36 = vld [vmem:[%s2340_s12 + $0x8] sm:$0xf] }
  0x19   : > { %921 = vmatpush.bf16.msra.mxu0 %v1979_v12  ;;  %v2008_v38 = vld [vmem:[%s2340_s12 + $0xc] sm:$0xf]  ;;  %v1591_v40 = vor.u32 %v2009_v33, %v1590_v32  ;;  %v1595_v41 = vor.u32 %v2007_v34, %v1592_v35  ;;  %v1599_v42 = vor.u32 %v2010_v37, %v1598_v36  ;;  %v1606_v44 = vld [vmem:[%s2340_s12 + $0x20] sm:$0xf]  ;;  %v2013_v45 = vld [vmem:[%s2340_s12 + $0x2c] sm:$0xf0] }
  0x1a   : > { %1010 = vmatpush.bf16.msra.mxu1 %v1987_v13  ;;  %v1603_v43 = vor.u32 %v2008_v38, %v1600_v39  ;;  %v2011_v46 = vld [vmem:[%s2340_s12 + $0x24] sm:$0xf]  ;;  %v1608_v47 = vld [vmem:[%s2340_s12 + $0x30] sm:$0xf0]  ;;  %v1614_v48 = vld [vmem:[%s2340_s12 + $0x28] sm:$0xf]  ;;  %v1607_v52 = vor.u32 %v2013_v45, %v1606_v44 }
  0x1b   : > { %1099 = vmatpush.bf16.msra.mxu2 %v1995_v14  ;;  %v2014_v49 = vld [vmem:[%s2340_s12 + $0x34] sm:$0xf0]  ;;  %v2012_v50 = vld [vmem:[%s2340_s12 + $0x2c] sm:$0xf]  ;;  %v1616_v51 = vld [vmem:[%s2340_s12 + $0x38] sm:$0xf0]  ;;  %v1611_v53 = vor.u32 %v2011_v46, %v1608_v47 }
  0x1c   : > { %1188 = vmatpush.bf16.msra.mxu3 %v2003_v15  ;;  %v1615_v54 = vor.u32 %v2014_v49, %v1614_v48  ;;  %v1619_v55 = vor.u32 %v2012_v50, %v1616_v51  ;;  %v1622_v56 = vld [vmem:[%s2340_s12 + $0x40] sm:$0xf]  ;;  %v2017_v57 = vld [vmem:[%s2340_s12 + $0x4c] sm:$0xf0]  ;;  %v2015_v58 = vld [vmem:[%s2340_s12 + $0x44] sm:$0xf] }
  0x1d   : > { %922 = vmatpush.bf16.msra.mxu0 %v1978_v16  ;;  %v1624_v59 = vld [vmem:[%s2340_s12 + $0x50] sm:$0xf0]  ;;  %v1630_v60 = vld [vmem:[%s2340_s12 + $0x48] sm:$0xf]  ;;  %v2018_v61 = vld [vmem:[%s2340_s12 + $0x54] sm:$0xf0]  ;;  %v1623_v0 = vor.u32 %v2017_v57, %v1622_v56 }
  0x1e   : > { %1011 = vmatpush.bf16.msra.mxu1 %v1986_v17  ;;  %v2016_v62 = vld [vmem:[%s2340_s12 + $0x4c] sm:$0xf]  ;;  %v1632_v63 = vld [vmem:[%s2340_s12 + $0x58] sm:$0xf0]  ;;  %v1627_v1 = vor.u32 %v2015_v58, %v1624_v59  ;;  %v1631_v2 = vor.u32 %v2018_v61, %v1630_v60  ;;  %v1638_v4 = vld [vmem:[%s2340_s12 + $0x60] sm:$0xf] }
  0x1f   : > { %1100 = vmatpush.bf16.msra.mxu2 %v1994_v18  ;;  %v1635_v3 = vor.u32 %v2016_v62, %v1632_v63  ;;  %v2021_v5 = vld [vmem:[%s2340_s12 + $0x6c] sm:$0xf0]  ;;  %v2019_v6 = vld [vmem:[%s2340_s12 + $0x64] sm:$0xf]  ;;  %v1640_v7 = vld [vmem:[%s2340_s12 + $0x70] sm:$0xf0] }
  0x20   : > { %1189 = vmatpush.bf16.msra.mxu3 %v2002_v19  ;;  %v1646_v8 = vld [vmem:[%s2340_s12 + $0x68] sm:$0xf]  ;;  %v2022_v9 = vld [vmem:[%s2340_s12 + $0x74] sm:$0xf0]  ;;  %v2020_v10 = vld [vmem:[%s2340_s12 + $0x6c] sm:$0xf]  ;;  %v1639_v12 = vor.u32 %v2021_v5, %v1638_v4  ;;  %v1643_v13 = vor.u32 %v2019_v6, %v1640_v7 }
  0x21   : > { %923 = vmatpush.bf16.msra.mxu0 %v1977_v20  ;;  %v1648_v11 = vld [vmem:[%s2340_s12 + $0x78] sm:$0xf0]  ;;  %v1647_v14 = vor.u32 %v2022_v9, %v1646_v8  ;;  %v1654_v16 = vld [vmem:[%s2340_s12 + $0x80] sm:$0xf]  ;;  %v2025_v17 = vld [vmem:[%s2340_s12 + $0x8c] sm:$0xf0] }
  0x22   : > { %1012 = vmatpush.bf16.msra.mxu1 %v1985_v21  ;;  %v1651_v15 = vor.u32 %v2020_v10, %v1648_v11  ;;  %v2023_v18 = vld [vmem:[%s2340_s12 + $0x84] sm:$0xf]  ;;  %v1656_v19 = vld [vmem:[%s2340_s12 + $0x90] sm:$0xf0]  ;;  %v1662_v20 = vld [vmem:[%s2340_s12 + $0x88] sm:$0xf] }
  0x23   : > { %1101 = vmatpush.bf16.msra.mxu2 %v1993_v22  ;;  %v2026_v21 = vld [vmem:[%s2340_s12 + $0x94] sm:$0xf0]  ;;  %v2024_v22 = vld [vmem:[%s2340_s12 + $0x8c] sm:$0xf]  ;;  %v1678_v32 = vld [vmem:[%s2340_s12 + $0xa8] sm:$0xf] }
  0x24   : > { %1190 = vmatpush.bf16.msra.mxu3 %v2001_v23  ;;  %v1664_v23 = vld [vmem:[%s2340_s12 + $0x98] sm:$0xf0]  ;;  %v2030_v33 = vld [vmem:[%s2340_s12 + $0xb4] sm:$0xf0]  ;;  %v2028_v34 = vld [vmem:[%s2340_s12 + $0xac] sm:$0xf] }
  0x25   : > { %924 = vmatpush.bf16.msra.mxu0 %v1976_v24  ;;  %v1655_v24 = vor.u32 %v2025_v17, %v1654_v16  ;;  %v1680_v35 = vld [vmem:[%s2340_s12 + $0xb8] sm:$0xf0]  ;;  %v1679_v38 = vor.u32 %v2030_v33, %v1678_v32  ;;  %v1694_v44 = vld [vmem:[%s2340_s12 + $0xc8] sm:$0xf]  ;;  %v2034_v45 = vld [vmem:[%s2340_s12 + $0xd4] sm:$0xf0] }
  0x26   : > { %1013 = vmatpush.bf16.msra.mxu1 %v1984_v25  ;;  %v1659_v25 = vor.u32 %v2023_v18, %v1656_v19  ;;  %v1683_v39 = vor.u32 %v2028_v34, %v1680_v35  ;;  %v2032_v46 = vld [vmem:[%s2340_s12 + $0xcc] sm:$0xf]  ;;  %v1696_v47 = vld [vmem:[%s2340_s12 + $0xd8] sm:$0xf0]  ;;  %v1695_v50 = vor.u32 %v2034_v45, %v1694_v44  ;;  %v1710_v56 = vld [vmem:[%s2340_s12 + $0xe8] sm:$0xf] }
  0x27   : > { %1102 = vmatpush.bf16.msra.mxu2 %v1992_v26  ;;  %v1663_v26 = vor.u32 %v2026_v21, %v1662_v20  ;;  %v1699_v51 = vor.u32 %v2032_v46, %v1696_v47  ;;  %v2038_v57 = vld [vmem:[%s2340_s12 + $0xf4] sm:$0xf0]  ;;  %v2036_v58 = vld [vmem:[%s2340_s12 + $0xec] sm:$0xf]  ;;  %v1712_v59 = vld [vmem:[%s2340_s12 + $0xf8] sm:$0xf0] }
  0x28   : > { %1191 = vmatpush.bf16.msra.mxu3 %v2000_v27  ;;  %v1667_v27 = vor.u32 %v2024_v22, %v1664_v23  ;;  %v1711_v62 = vor.u32 %v2038_v57, %v1710_v56  ;;  %v1715_v63 = vor.u32 %v2036_v58, %v1712_v59  ;;  %v1726_v4 = vld [vmem:[%s2340_s12 + $0x108] sm:$0xf]  ;;  %v2042_v5 = vld [vmem:[%s2340_s12 + $0x114] sm:$0xf0]  ;;  %v2040_v6 = vld [vmem:[%s2340_s12 + $0x10c] sm:$0xf] }
  0x29   : > { %925 = vmatpush.bf16.msra.mxu0 %v1975_v28  ;;  %v1670_v28 = vld [vmem:[%s2340_s12 + $0xa0] sm:$0xf]  ;;  %v1728_v7 = vld [vmem:[%s2340_s12 + $0x118] sm:$0xf0]  ;;  %v2045_v21 = vld [vmem:[%s2340_s12 + $0x12c] sm:$0xf0] }
  0x2a   : > { %1014 = vmatpush.bf16.msra.mxu1 %v1983_v29  ;;  %v2029_v29 = vld [vmem:[%s2340_s12 + $0xac] sm:$0xf0]  ;;  %v1734_v20 = vld [vmem:[%s2340_s12 + $0x120] sm:$0xf]  ;;  %v2043_v22 = vld [vmem:[%s2340_s12 + $0x124] sm:$0xf] }
  0x2b   : > { %1103 = vmatpush.bf16.msra.mxu2 %v1991_v30  ;;  %v2027_v30 = vld [vmem:[%s2340_s12 + $0xa4] sm:$0xf]  ;;  %v1671_v36 = vor.u32 %v2029_v29, %v1670_v28  ;;  %v1736_v23 = vld [vmem:[%s2340_s12 + $0x130] sm:$0xf0]  ;;  %v2443_v29 = vld [vmem:[%s2558_s2] ss:$0 sm:$0xff]  ;;  %v1735_v33 = vor.u32 %v2045_v21, %v1734_v20 }
  0x2c   : > { %1192 = vmatpush.bf16.msra.mxu3 %v1999_v31  ;;  %926 = vmatmul.bf16.vlgmr.msra.gmra.mxu0 %v1591_v40  ;;  %v1672_v31 = vld [vmem:[%s2340_s12 + $0xb0] sm:$0xf0]  ;;  %v1686_v40 = vld [vmem:[%s2340_s12 + $0xc0] sm:$0xf]  ;;  %v1739_v34 = vor.u32 %v2043_v22, %v1736_v23  ;;  %v1758_v56 = vld [vmem:[%s2340_s12 + $0x148] sm:$0xf] }
  0x2d   : > { %1015 = vmatmul.bf16.vlgmr.msra.gmra.mxu1 %v1595_v41  ;;  %v1675_v37 = vor.u32 %v2027_v30, %v1672_v31  ;;  %v2033_v41 = vld [vmem:[%s2340_s12 + $0xcc] sm:$0xf0]  ;;  %v2050_v57 = vld [vmem:[%s2340_s12 + $0x154] sm:$0xf0]  ;;  %v2048_v58 = vld [vmem:[%s2340_s12 + $0x14c] sm:$0xf] }
  0x2e   : > { %1104 = vmatmul.bf16.vlgmr.msra.gmra.mxu2 %v1599_v42  ;;  %v2031_v42 = vld [vmem:[%s2340_s12 + $0xc4] sm:$0xf]  ;;  %v1687_v48 = vor.u32 %v2033_v41, %v1686_v40  ;;  %v1760_v59 = vld [vmem:[%s2340_s12 + $0x158] sm:$0xf0]  ;;  %v2053_v20 = vld [vmem:[%s2340_s12 + $0x16c] sm:$0xf0] }
  0x2f   : > { %1193 = vmatmul.bf16.vlgmr.msra.gmra.mxu3 %v1603_v43  ;;  %v1688_v43 = vld [vmem:[%s2340_s12 + $0xd0] sm:$0xf0]  ;;  %v2051_v21 = vld [vmem:[%s2340_s12 + $0x164] sm:$0xf]  ;;  %v1774_v23 = vld [vmem:[%s2340_s12 + $0x168] sm:$0xf] }
  0x30   : > { %v1691_v49 = vor.u32 %v2031_v42, %v1688_v43  ;;  %v1768_v22 = vld [vmem:[%s2340_s12 + $0x170] sm:$0xf0] }
  0x3c   : > { %931 = vmatmul.bf16.gmra.mxu0 %v1607_v52  ;;  %v1702_v52 = vld [vmem:[%s2340_s12 + $0xe0] sm:$0xf] }
  0x3d   : > { %1020 = vmatmul.bf16.gmra.mxu1 %v1611_v53  ;;  %v2037_v53 = vld [vmem:[%s2340_s12 + $0xec] sm:$0xf0] }
  0x3e   : > { %1109 = vmatmul.bf16.gmra.mxu2 %v1615_v54  ;;  %v2035_v54 = vld [vmem:[%s2340_s12 + $0xe4] sm:$0xf]  ;;  %v1703_v60 = vor.u32 %v2037_v53, %v1702_v52  ;;  %v1750_v52 = vld [vmem:[%s2340_s12 + $0x140] sm:$0xf]  ;;  %v2049_v53 = vld [vmem:[%s2340_s12 + $0x14c] sm:$0xf0] }
  0x3f   : > { %1198 = vmatmul.bf16.gmra.mxu3 %v1619_v55  ;;  %v1704_v55 = vld [vmem:[%s2340_s12 + $0xf0] sm:$0xf0] }
  0x40   : > { %v1707_v61 = vor.u32 %v2035_v54, %v1704_v55  ;;  %v2047_v54 = vld [vmem:[%s2340_s12 + $0x144] sm:$0xf]  ;;  %v1752_v55 = vld [vmem:[%s2340_s12 + $0x150] sm:$0xf0] }
  0x4c   : > { %936 = vmatmul.bf16.gmra.mxu0 %v1623_v0  ;;  %v1718_v0 = vld [vmem:[%s2340_s12 + $0x100] sm:$0xf] }
  0x4d   : > { %1025 = vmatmul.bf16.gmra.mxu1 %v1627_v1  ;;  %v2041_v1 = vld [vmem:[%s2340_s12 + $0x10c] sm:$0xf0] }
  0x4e   : > { %1114 = vmatmul.bf16.gmra.mxu2 %v1631_v2  ;;  %v2039_v2 = vld [vmem:[%s2340_s12 + $0x104] sm:$0xf]  ;;  %v1719_v8 = vor.u32 %v2041_v1, %v1718_v0  ;;  %v1751_v0 = vor.u32 %v2049_v53, %v1750_v52  ;;  %v1755_v1 = vor.u32 %v2047_v54, %v1752_v55  ;;  %v2057_v52 = vld [vmem:[%s2340_s12 + $0x18c] sm:$0xf0]  ;;  %v1784_v54 = vld [vmem:[%s2340_s12 + $0x190] sm:$0xf0] }
  0x4f   : > { %1203 = vmatmul.bf16.gmra.mxu3 %v1635_v3  ;;  %v1720_v3 = vld [vmem:[%s2340_s12 + $0x110] sm:$0xf0]  ;;  %v2055_v53 = vld [vmem:[%s2340_s12 + $0x184] sm:$0xf]  ;;  %v1790_v55 = vld [vmem:[%s2340_s12 + $0x188] sm:$0xf] }
  0x50   : > { %v1723_v9 = vor.u32 %v2039_v2, %v1720_v3 }
  0x5c   : > { %941 = vmatmul.bf16.gmra.mxu0 %v1639_v12  ;;  %v1727_v12 = vor.u32 %v2042_v5, %v1726_v4  ;;  %v1759_v5 = vor.u32 %v2050_v57, %v1758_v56  ;;  %v2058_v56 = vld [vmem:[%s2340_s12 + $0x194] sm:$0xf0]  ;;  %v2056_v57 = vld [vmem:[%s2340_s12 + $0x18c] sm:$0xf] }
  0x5d   : > { %1030 = vmatmul.bf16.gmra.mxu1 %v1643_v13  ;;  %v1731_v13 = vor.u32 %v2040_v6, %v1728_v7  ;;  %v1763_v6 = vor.u32 %v2048_v58, %v1760_v59  ;;  %v1792_v58 = vld [vmem:[%s2340_s12 + $0x198] sm:$0xf0] }
  0x5e   : > { %1119 = vmatmul.bf16.gmra.mxu2 %v1647_v14 }
  0x5f   : > { %1208 = vmatmul.bf16.gmra.mxu3 %v1651_v15 }
  0x6c   : > { %946 = vmatmul.bf16.gmra.mxu0 %v1655_v24  ;;  %v1742_v24 = vld [vmem:[%s2340_s12 + $0x128] sm:$0xf] }
  0x6d   : > { %1035 = vmatmul.bf16.gmra.mxu1 %v1659_v25  ;;  %v2046_v25 = vld [vmem:[%s2340_s12 + $0x134] sm:$0xf0] }
  0x6e   : > { %1124 = vmatmul.bf16.gmra.mxu2 %v1663_v26  ;;  %v2044_v26 = vld [vmem:[%s2340_s12 + $0x12c] sm:$0xf] }
  0x6f   : > { %1213 = vmatmul.bf16.gmra.mxu3 %v1667_v27  ;;  %v1744_v27 = vld [vmem:[%s2340_s12 + $0x138] sm:$0xf0] }
  0x7c   : > { %951 = vmatmul.bf16.gmra.mxu0 %v1671_v36 }
  0x7d   : > { %1040 = vmatmul.bf16.gmra.mxu1 %v1675_v37 }
  0x7e   : > { %1129 = vmatmul.bf16.gmra.mxu2 %v1679_v38  ;;  %v1743_v38 = vor.u32 %v2046_v25, %v1742_v24  ;;  %v2054_v24 = vld [vmem:[%s2340_s12 + $0x174] sm:$0xf0]  ;;  %v2052_v25 = vld [vmem:[%s2340_s12 + $0x16c] sm:$0xf] }
  0x7f   : > { %1218 = vmatmul.bf16.gmra.mxu3 %v1683_v39  ;;  %v1747_v39 = vor.u32 %v2044_v26, %v1744_v27  ;;  %v1776_v26 = vld [vmem:[%s2340_s12 + $0x178] sm:$0xf0] }
  0x8c   : > { %956 = vmatmul.bf16.gmra.mxu0 %v1687_v48 }
  0x8d   : > { %1045 = vmatmul.bf16.gmra.mxu1 %v1691_v49 }
  0x8e   : > { %1134 = vmatmul.bf16.gmra.mxu2 %v1695_v50 }
  0x8f   : > { %1223 = vmatmul.bf16.gmra.mxu3 %v1699_v51 }
  0x9c   : > { %961 = vmatmul.bf16.gmra.mxu0 %v1703_v60 }
  0x9d   : > { %1050 = vmatmul.bf16.gmra.mxu1 %v1707_v61 }
  0x9e   : > { %1139 = vmatmul.bf16.gmra.mxu2 %v1711_v62 }
  0x9f   : > { %1228 = vmatmul.bf16.gmra.mxu3 %v1715_v63 }
  0xa9   : > { %v927_v10 = vpop.f32.mrf.mxu0 }
  0xaa   : > { %v1016_v11 = vpop.f32.mrf.mxu1 }
  0xab   : > { %v1017_v14 = vadd.f32 %v1016_v11, %v927_v10 }
  0xac   : > { %966 = vmatmul.bf16.gmra.mxu0 %v1719_v8 }
  0xad   : > { %1055 = vmatmul.bf16.gmra.mxu1 %v1723_v9 }
  0xae   : > { %1144 = vmatmul.bf16.gmra.mxu2 %v1727_v12 }
  0xaf   : > { %1233 = vmatmul.bf16.gmra.mxu3 %v1731_v13 }
  0xb1   : > { %v1105_v15 = vpop.f32.mrf.mxu2  ;;  %v929_v17 = vpop.f32.mrf.mxu0 }
  0xb2   : > { %v1194_v16 = vpop.f32.mrf.mxu3  ;;  %v1018_v18 = vpop.f32.mrf.mxu1  ;;  %v1106_v19 = vadd.f32 %v1105_v15, %v1017_v14 }
  0xb3   : > { %v1019_v30 = vadd.f32 %v1018_v18, %v929_v17 }
  0xb4   : > { %v1195_v28 = vadd.f32 %v1194_v16, %v1106_v19  ;;  %v1766_v19 = vld [vmem:[%s2340_s12 + $0x160] sm:$0xf] }
  0xb6   : > { %v1377_v40 = vadd.f32 %v2443_v29, %v1195_v28 }
  0xb8   : > { %v1409_v43 = vmax.f32 %v1377_v40, 0.0 }
  0xb9   : > { %v1107_v31 = vpop.f32.mrf.mxu2  ;;  %v932_v36 = vpop.f32.mrf.mxu0 }
  0xba   : > { %v1196_v32 = vpop.f32.mrf.mxu3  ;;  %v1108_v35 = vadd.f32 %v1107_v31, %v1019_v30  ;;  %v1021_v37 = vpop.f32.mrf.mxu1 }
  0xbb   : > { %v1022_v45 = vadd.f32 %v1021_v37, %v932_v36  ;;  %v1775_v37 = vor.u32 %v2054_v24, %v1774_v23  ;;  %v2062_v23 = vld [vmem:[%s2340_s12 + $0x1b4] sm:$0xf0]  ;;  %v2060_v24 = vld [vmem:[%s2340_s12 + $0x1ac] sm:$0xf] }
  0xbc   : > { %v1197_v41 = vadd.f32 %v1196_v32, %v1108_v35  ;;  %971 = vmatmul.bf16.gmra.mxu0 %v1735_v33  ;;  %v1767_v32 = vor.u32 %v2053_v20, %v1766_v19  ;;  %v1771_v33 = vor.u32 %v2051_v21, %v1768_v22  ;;  %v2061_v19 = vld [vmem:[%s2340_s12 + $0x1ac] sm:$0xf0]  ;;  %v2059_v20 = vld [vmem:[%s2340_s12 + $0x1a4] sm:$0xf]  ;;  %v1800_v21 = vld [vmem:[%s2340_s12 + $0x1b0] sm:$0xf0] }
  0xbd   : > { %1060 = vmatmul.bf16.gmra.mxu1 %v1739_v34  ;;  %v1806_v22 = vld [vmem:[%s2340_s12 + $0x1a8] sm:$0xf] }
  0xbe   : > { %v1378_v42 = vadd.f32 %v2443_v29, %v1197_v41  ;;  %1149 = vmatmul.bf16.gmra.mxu2 %v1743_v38  ;;  %v1779_v38 = vor.u32 %v2052_v25, %v1776_v26  ;;  %v1808_v25 = vld [vmem:[%s2340_s12 + $0x1b8] sm:$0xf0] }
  0xbf   : > { %1238 = vmatmul.bf16.gmra.mxu3 %v1747_v39 }
  0xc0   : > { %v1410_v44 = vmax.f32 %v1378_v42, 0.0 }
  0xc1   : > { %v1110_v46 = vpop.f32.mrf.mxu2  ;;  %v934_v49 = vpop.f32.mrf.mxu0 }
  0xc2   : > { %v1199_v47 = vpop.f32.mrf.mxu3  ;;  %v2074_v48 = vpack.c.bf16 %v1410_v44, %v1409_v43  ;;  %v1023_v50 = vpop.f32.mrf.mxu1  ;;  %v1111_v51 = vadd.f32 %v1110_v46, %v1022_v45 }
  0xc3   : > { %v1024_v61 = vadd.f32 %v1023_v50, %v934_v49 }
  0xc4   : > { %2075 = vst [vmem:[%s2451_s21] sm:$0xff] %v2074_v48   ;;  %v1200_v60 = vadd.f32 %v1199_v47, %v1111_v51  ;;  %v1782_v51 = vld [vmem:[%s2340_s12 + $0x180] sm:$0xf] }
  0xc6   : > { %v1379_v7 = vadd.f32 %v2443_v29, %v1200_v60 }
  0xc8   : > { %v1411_v10 = vmax.f32 %v1379_v7, 0.0 }
  0xc9   : > { %v1112_v62 = vpop.f32.mrf.mxu2  ;;  %v937_v3 = vpop.f32.mrf.mxu0 }
  0xca   : > { %v1201_v63 = vpop.f32.mrf.mxu3  ;;  %v1113_v2 = vadd.f32 %v1112_v62, %v1024_v61  ;;  %v1026_v4 = vpop.f32.mrf.mxu1 }
  0xcb   : > { %v1027_v12 = vadd.f32 %v1026_v4, %v937_v3  ;;  %v1791_v4 = vor.u32 %v2058_v56, %v1790_v55  ;;  %v2066_v55 = vld [vmem:[%s2340_s12 + $0x1d4] sm:$0xf0]  ;;  %v2064_v56 = vld [vmem:[%s2340_s12 + $0x1cc] sm:$0xf] }
  0xcc   : > { %v1202_v8 = vadd.f32 %v1201_v63, %v1113_v2  ;;  %976 = vmatmul.bf16.gmra.mxu0 %v1751_v0  ;;  %v1783_v63 = vor.u32 %v2057_v52, %v1782_v51  ;;  %v1787_v0 = vor.u32 %v2055_v53, %v1784_v54  ;;  %v2065_v51 = vld [vmem:[%s2340_s12 + $0x1cc] sm:$0xf0]  ;;  %v2063_v52 = vld [vmem:[%s2340_s12 + $0x1c4] sm:$0xf]  ;;  %v1816_v53 = vld [vmem:[%s2340_s12 + $0x1d0] sm:$0xf0] }
  0xcd   : > { %1065 = vmatmul.bf16.gmra.mxu1 %v1755_v1  ;;  %v1822_v54 = vld [vmem:[%s2340_s12 + $0x1c8] sm:$0xf] }
  0xce   : > { %v1380_v9 = vadd.f32 %v2443_v29, %v1202_v8  ;;  %1154 = vmatmul.bf16.gmra.mxu2 %v1759_v5  ;;  %v1795_v5 = vor.u32 %v2056_v57, %v1792_v58  ;;  %v1824_v57 = vld [vmem:[%s2340_s12 + $0x1d8] sm:$0xf0] }
  0xcf   : > { %1243 = vmatmul.bf16.gmra.mxu3 %v1763_v6 }
  0xd0   : > { %v1412_v11 = vmax.f32 %v1380_v9, 0.0 }
  0xd1   : > { %v1115_v13 = vpop.f32.mrf.mxu2  ;;  %v939_v16 = vpop.f32.mrf.mxu0 }
  0xd2   : > { %v1204_v14 = vpop.f32.mrf.mxu3  ;;  %v2079_v15 = vpack.c.bf16 %v1412_v11, %v1411_v10  ;;  %v1028_v17 = vpop.f32.mrf.mxu1  ;;  %v1116_v18 = vadd.f32 %v1115_v13, %v1027_v12 }
  0xd3   : > { %v1029_v28 = vadd.f32 %v1028_v17, %v939_v16 }
  0xd4   : > { %2151 = vst [vmem:[%s2451_s21 + $0x8] sm:$0xff] %v2079_v15   ;;  %v1205_v27 = vadd.f32 %v1204_v14, %v1116_v18  ;;  %v1798_v18 = vld [vmem:[%s2340_s12 + $0x1a0] sm:$0xf] }
  0xd6   : > { %v1381_v39 = vadd.f32 %v2443_v29, %v1205_v27 }
  0xd8   : > { %v1413_v42 = vmax.f32 %v1381_v39, 0.0 }
  0xd9   : > { %v1117_v30 = vpop.f32.mrf.mxu2  ;;  %v942_v35 = vpop.f32.mrf.mxu0 }
  0xda   : > { %v1206_v31 = vpop.f32.mrf.mxu3  ;;  %v1118_v34 = vadd.f32 %v1117_v30, %v1029_v28  ;;  %v1031_v36 = vpop.f32.mrf.mxu1 }
  0xdb   : > { %v1032_v44 = vadd.f32 %v1031_v36, %v942_v35  ;;  %v1807_v36 = vor.u32 %v2062_v23, %v1806_v22  ;;  %v2070_v22 = vld [vmem:[%s2340_s12 + $0x1f4] sm:$0xf0]  ;;  %v2068_v23 = vld [vmem:[%s2340_s12 + $0x1ec] sm:$0xf] }
  0xdc   : > { %v1207_v40 = vadd.f32 %v1206_v31, %v1118_v34  ;;  %981 = vmatmul.bf16.gmra.mxu0 %v1767_v32  ;;  %v1799_v31 = vor.u32 %v2061_v19, %v1798_v18  ;;  %v1803_v32 = vor.u32 %v2059_v20, %v1800_v21  ;;  %v2069_v18 = vld [vmem:[%s2340_s12 + $0x1ec] sm:$0xf0]  ;;  %v2067_v19 = vld [vmem:[%s2340_s12 + $0x1e4] sm:$0xf]  ;;  %v1832_v20 = vld [vmem:[%s2340_s12 + $0x1f0] sm:$0xf0] }
  0xdd   : > { %1070 = vmatmul.bf16.gmra.mxu1 %v1771_v33  ;;  %v1838_v21 = vld [vmem:[%s2340_s12 + $0x1e8] sm:$0xf] }
  0xde   : > { %v1382_v41 = vadd.f32 %v2443_v29, %v1207_v40  ;;  %1159 = vmatmul.bf16.gmra.mxu2 %v1775_v37  ;;  %v1811_v37 = vor.u32 %v2060_v24, %v1808_v25  ;;  %v1840_v24 = vld [vmem:[%s2340_s12 + $0x1f8] sm:$0xf0] }
  0xdf   : > { %1248 = vmatmul.bf16.gmra.mxu3 %v1779_v38 }
  0xe0   : > { %v1414_v43 = vmax.f32 %v1382_v41, 0.0 }
  0xe1   : > { %v1120_v45 = vpop.f32.mrf.mxu2  ;;  %v944_v48 = vpop.f32.mrf.mxu0 }
  0xe2   : > { %v1209_v46 = vpop.f32.mrf.mxu3  ;;  %v2084_v47 = vpack.c.bf16 %v1414_v43, %v1413_v42  ;;  %v1033_v49 = vpop.f32.mrf.mxu1  ;;  %v1121_v50 = vadd.f32 %v1120_v45, %v1032_v44 }
  0xe3   : > { %v1034_v60 = vadd.f32 %v1033_v49, %v944_v48 }
  0xe4   : > { %2152 = vst [vmem:[%s2451_s21 + $0x10] sm:$0xff] %v2084_v47   ;;  %v1210_v59 = vadd.f32 %v1209_v46, %v1121_v50  ;;  %v1814_v50 = vld [vmem:[%s2340_s12 + $0x1c0] sm:$0xf] }
  0xe6   : > { %v1383_v6 = vadd.f32 %v2443_v29, %v1210_v59 }
  0xe8   : > { %v1415_v9 = vmax.f32 %v1383_v6, 0.0 }
  0xe9   : > { %v1122_v61 = vpop.f32.mrf.mxu2  ;;  %v947_v2 = vpop.f32.mrf.mxu0 }
  0xea   : > { %v1211_v62 = vpop.f32.mrf.mxu3  ;;  %v1123_v1 = vadd.f32 %v1122_v61, %v1034_v60  ;;  %v1036_v3 = vpop.f32.mrf.mxu1 }
  0xeb   : > { %v1037_v11 = vadd.f32 %v1036_v3, %v947_v2  ;;  %v1823_v3 = vor.u32 %v2066_v55, %v1822_v54 }
  0xec   : > { %v1212_v7 = vadd.f32 %v1211_v62, %v1123_v1  ;;  %986 = vmatmul.bf16.gmra.mxu0 %v1783_v63  ;;  %v1815_v62 = vor.u32 %v2065_v51, %v1814_v50  ;;  %v1819_v63 = vor.u32 %v2063_v52, %v1816_v53 }
  0xed   : > { %1075 = vmatmul.bf16.gmra.mxu1 %v1787_v0 }
  0xee   : > { %v1384_v8 = vadd.f32 %v2443_v29, %v1212_v7  ;;  %1164 = vmatmul.bf16.gmra.mxu2 %v1791_v4  ;;  %v1827_v4 = vor.u32 %v2064_v56, %v1824_v57 }
  0xef   : > { %1253 = vmatmul.bf16.gmra.mxu3 %v1795_v5 }
  0xf0   : > { %v1416_v10 = vmax.f32 %v1384_v8, 0.0 }
  0xf1   : > { %v1125_v12 = vpop.f32.mrf.mxu2  ;;  %v949_v15 = vpop.f32.mrf.mxu0 }
  0xf2   : > { %v1214_v13 = vpop.f32.mrf.mxu3  ;;  %v2089_v14 = vpack.c.bf16 %v1416_v10, %v1415_v9  ;;  %v1038_v16 = vpop.f32.mrf.mxu1  ;;  %v1126_v17 = vadd.f32 %v1125_v12, %v1037_v11 }
  0xf3   : > { %v1039_v27 = vadd.f32 %v1038_v16, %v949_v15 }
  0xf4   : > { %2153 = vst [vmem:[%s2451_s21 + $0x18] sm:$0xff] %v2089_v14   ;;  %v1215_v26 = vadd.f32 %v1214_v13, %v1126_v17  ;;  %v1830_v17 = vld [vmem:[%s2340_s12 + $0x1e0] sm:$0xf] }
  0xf6   : > { %v1385_v38 = vadd.f32 %v2443_v29, %v1215_v26 }
  0xf8   : > { %v1417_v41 = vmax.f32 %v1385_v38, 0.0 }
  0xf9   : > { %v1127_v28 = vpop.f32.mrf.mxu2  ;;  %v952_v34 = vpop.f32.mrf.mxu0 }
  0xfa   : > { %v1216_v30 = vpop.f32.mrf.mxu3  ;;  %v1128_v33 = vadd.f32 %v1127_v28, %v1039_v27  ;;  %v1041_v35 = vpop.f32.mrf.mxu1 }
  0xfb   : > { %v1042_v43 = vadd.f32 %v1041_v35, %v952_v34  ;;  %v1839_v35 = vor.u32 %v2070_v22, %v1838_v21 }
  0xfc   : > { %v1217_v39 = vadd.f32 %v1216_v30, %v1128_v33  ;;  %991 = vmatmul.bf16.gmra.mxu0 %v1799_v31  ;;  %v1831_v30 = vor.u32 %v2069_v18, %v1830_v17  ;;  %v1835_v31 = vor.u32 %v2067_v19, %v1832_v20 }
  0xfd   : > { %1080 = vmatmul.bf16.gmra.mxu1 %v1803_v32 }
  0xfe   : > { %v1386_v40 = vadd.f32 %v2443_v29, %v1217_v39  ;;  %1169 = vmatmul.bf16.gmra.mxu2 %v1807_v36  ;;  %v1843_v36 = vor.u32 %v2068_v23, %v1840_v24 }
  0xff   : > { %1258 = vmatmul.bf16.gmra.mxu3 %v1811_v37 }
 0x100   : > { %v1418_v42 = vmax.f32 %v1386_v40, 0.0 }
 0x101   : > { %v1130_v44 = vpop.f32.mrf.mxu2  ;;  %v954_v47 = vpop.f32.mrf.mxu0 }
 0x102   : > { %v1219_v45 = vpop.f32.mrf.mxu3  ;;  %v2094_v46 = vpack.c.bf16 %v1418_v42, %v1417_v41  ;;  %v1043_v48 = vpop.f32.mrf.mxu1  ;;  %v1131_v49 = vadd.f32 %v1130_v44, %v1042_v43 }
 0x103   : > { %v1044_v59 = vadd.f32 %v1043_v48, %v954_v47 }
 0x104   : > { %2154 = vst [vmem:[%s2451_s21 + $0x20] sm:$0xff] %v2094_v46   ;;  %v1220_v58 = vadd.f32 %v1219_v45, %v1131_v49 }
 0x106   : > { %v1387_v5 = vadd.f32 %v2443_v29, %v1220_v58 }
 0x108   : > { %v1419_v8 = vmax.f32 %v1387_v5, 0.0 }
 0x109   : > { %v1132_v60 = vpop.f32.mrf.mxu2  ;;  %v957_v1 = vpop.f32.mrf.mxu0 }
 0x10a   : > { %v1221_v61 = vpop.f32.mrf.mxu3  ;;  %v1133_v0 = vadd.f32 %v1132_v60, %v1044_v59  ;;  %v1046_v2 = vpop.f32.mrf.mxu1 }
 0x10b   : > { %v1047_v10 = vadd.f32 %v1046_v2, %v957_v1 }
 0x10c   : > { %v1222_v6 = vadd.f32 %v1221_v61, %v1133_v0  ;;  %996 = vmatmul.bf16.gmra.mxu0 %v1815_v62 }
 0x10d   : > { %1085 = vmatmul.bf16.gmra.mxu1 %v1819_v63 }
 0x10e   : > { %v1388_v7 = vadd.f32 %v2443_v29, %v1222_v6  ;;  %1174 = vmatmul.bf16.gmra.mxu2 %v1823_v3 }
 0x10f   : > { %1263 = vmatmul.bf16.gmra.mxu3 %v1827_v4 }
 0x110   : > { %v1420_v9 = vmax.f32 %v1388_v7, 0.0 }
 0x111   : > { %v1135_v11 = vpop.f32.mrf.mxu2  ;;  %v959_v14 = vpop.f32.mrf.mxu0 }
 0x112   : > { %v1224_v12 = vpop.f32.mrf.mxu3  ;;  %v2099_v13 = vpack.c.bf16 %v1420_v9, %v1419_v8  ;;  %v1048_v15 = vpop.f32.mrf.mxu1  ;;  %v1136_v16 = vadd.f32 %v1135_v11, %v1047_v10 }
 0x113   : > { %v1049_v26 = vadd.f32 %v1048_v15, %v959_v14 }
 0x114   : > { %2155 = vst [vmem:[%s2451_s21 + $0x28] sm:$0xff] %v2099_v13   ;;  %v1225_v25 = vadd.f32 %v1224_v12, %v1136_v16 }
 0x116   : > { %v1389_v37 = vadd.f32 %v2443_v29, %v1225_v25 }
 0x118   : > { %v1421_v40 = vmax.f32 %v1389_v37, 0.0 }
 0x119   : > { %v1137_v27 = vpop.f32.mrf.mxu2  ;;  %v962_v33 = vpop.f32.mrf.mxu0 }
 0x11a   : > { %v1226_v28 = vpop.f32.mrf.mxu3  ;;  %v1138_v32 = vadd.f32 %v1137_v27, %v1049_v26  ;;  %v1051_v34 = vpop.f32.mrf.mxu1 }
 0x11b   : > { %v1052_v42 = vadd.f32 %v1051_v34, %v962_v33 }
 0x11c   : > { %v1227_v38 = vadd.f32 %v1226_v28, %v1138_v32  ;;  %1001 = vmatmul.bf16.gmra.mxu0 %v1831_v30 }
 0x11d   : > { %1090 = vmatmul.bf16.gmra.mxu1 %v1835_v31 }
 0x11e   : > { %v1390_v39 = vadd.f32 %v2443_v29, %v1227_v38  ;;  %1179 = vmatmul.bf16.gmra.mxu2 %v1839_v35 }
 0x11f   : > { %1268 = vmatmul.bf16.gmra.mxu3 %v1843_v36 }
 0x120   : > { %v1422_v41 = vmax.f32 %v1390_v39, 0.0 }
 0x121   : > { %v1140_v43 = vpop.f32.mrf.mxu2  ;;  %v964_v46 = vpop.f32.mrf.mxu0 }
 0x122   : > { %v1229_v44 = vpop.f32.mrf.mxu3  ;;  %v2104_v45 = vpack.c.bf16 %v1422_v41, %v1421_v40  ;;  %v1053_v47 = vpop.f32.mrf.mxu1  ;;  %v1141_v48 = vadd.f32 %v1140_v43, %v1052_v42 }
 0x123   : > { %v1054_v50 = vadd.f32 %v1053_v47, %v964_v46 }
 0x124   : > { %2156 = vst [vmem:[%s2451_s21 + $0x30] sm:$0xff] %v2104_v45   ;;  %v1230_v49 = vadd.f32 %v1229_v44, %v1141_v48 }
 0x126   : > { %v1391_v56 = vadd.f32 %v2443_v29, %v1230_v49 }
 0x128   : > { %v1423_v59 = vmax.f32 %v1391_v56, 0.0 }
 0x129   : > { %v1142_v51 = vpop.f32.mrf.mxu2  ;;  %v967_v54 = vpop.f32.mrf.mxu0 }
 0x12a   : > { %v1231_v52 = vpop.f32.mrf.mxu3  ;;  %v1143_v53 = vadd.f32 %v1142_v51, %v1054_v50  ;;  %v1056_v55 = vpop.f32.mrf.mxu1 }
 0x12b   : > { %v1057_v61 = vadd.f32 %v1056_v55, %v967_v54 }
 0x12c   : > { %v1232_v57 = vadd.f32 %v1231_v52, %v1143_v53 }
 0x12e   : > { %v1392_v58 = vadd.f32 %v2443_v29, %v1232_v57 }
 0x130   : > { %v1424_v60 = vmax.f32 %v1392_v58, 0.0 }
 0x131   : > { %v1145_v62 = vpop.f32.mrf.mxu2  ;;  %v969_v1 = vpop.f32.mrf.mxu0 }
 0x132   : > { %v1234_v63 = vpop.f32.mrf.mxu3  ;;  %v2109_v0 = vpack.c.bf16 %v1424_v60, %v1423_v59  ;;  %v1058_v2 = vpop.f32.mrf.mxu1  ;;  %v1146_v3 = vadd.f32 %v1145_v62, %v1057_v61 }
 0x133   : > { %v1059_v5 = vadd.f32 %v1058_v2, %v969_v1 }
 0x134   : > { %2157 = vst [vmem:[%s2451_s21 + $0x38] sm:$0xff] %v2109_v0   ;;  %v1235_v4 = vadd.f32 %v1234_v63, %v1146_v3 }
 0x136   : > { %v1393_v11 = vadd.f32 %v2443_v29, %v1235_v4 }
 0x138   : > { %v1425_v14 = vmax.f32 %v1393_v11, 0.0 }
 0x139   : > { %v1147_v6 = vpop.f32.mrf.mxu2  ;;  %v972_v9 = vpop.f32.mrf.mxu0 }
 0x13a   : > { %v1236_v7 = vpop.f32.mrf.mxu3  ;;  %v1148_v8 = vadd.f32 %v1147_v6, %v1059_v5  ;;  %v1061_v10 = vpop.f32.mrf.mxu1 }
 0x13b   : > { %v1062_v16 = vadd.f32 %v1061_v10, %v972_v9 }
 0x13c   : > { %v1237_v12 = vadd.f32 %v1236_v7, %v1148_v8 }
 0x13e   : > { %v1394_v13 = vadd.f32 %v2443_v29, %v1237_v12 }
 0x140   : > { %v1426_v15 = vmax.f32 %v1394_v13, 0.0 }
 0x141   : > { %v1150_v17 = vpop.f32.mrf.mxu2  ;;  %v974_v20 = vpop.f32.mrf.mxu0 }
 0x142   : > { %v1239_v18 = vpop.f32.mrf.mxu3  ;;  %v2114_v19 = vpack.c.bf16 %v1426_v15, %v1425_v14  ;;  %v1063_v21 = vpop.f32.mrf.mxu1  ;;  %v1151_v22 = vadd.f32 %v1150_v17, %v1062_v16 }
 0x143   : > { %v1064_v24 = vadd.f32 %v1063_v21, %v974_v20 }
 0x144   : > { %2158 = vst [vmem:[%s2451_s21 + $0x40] sm:$0xff] %v2114_v19   ;;  %v1240_v23 = vadd.f32 %v1239_v18, %v1151_v22 }
 0x146   : > { %v1395_v31 = vadd.f32 %v2443_v29, %v1240_v23 }
 0x148   : > { %v1427_v34 = vmax.f32 %v1395_v31, 0.0 }
 0x149   : > { %v1152_v25 = vpop.f32.mrf.mxu2  ;;  %v977_v28 = vpop.f32.mrf.mxu0 }
 0x14a   : > { %v1241_v26 = vpop.f32.mrf.mxu3  ;;  %v1153_v27 = vadd.f32 %v1152_v25, %v1064_v24  ;;  %v1066_v30 = vpop.f32.mrf.mxu1 }
 0x14b   : > { %v1067_v36 = vadd.f32 %v1066_v30, %v977_v28 }
 0x14c   : > { %v1242_v32 = vadd.f32 %v1241_v26, %v1153_v27 }
 0x14e   : > { %v1396_v33 = vadd.f32 %v2443_v29, %v1242_v32 }
 0x150   : > { %v1428_v35 = vmax.f32 %v1396_v33, 0.0 }
 0x151   : > { %v1155_v37 = vpop.f32.mrf.mxu2  ;;  %v979_v40 = vpop.f32.mrf.mxu0 }
 0x152   : > { %v1244_v38 = vpop.f32.mrf.mxu3  ;;  %v2119_v39 = vpack.c.bf16 %v1428_v35, %v1427_v34  ;;  %v1068_v41 = vpop.f32.mrf.mxu1  ;;  %v1156_v42 = vadd.f32 %v1155_v37, %v1067_v36 }
 0x153   : > { %v1069_v44 = vadd.f32 %v1068_v41, %v979_v40 }
 0x154   : > { %2159 = vst [vmem:[%s2451_s21 + $0x48] sm:$0xff] %v2119_v39   ;;  %v1245_v43 = vadd.f32 %v1244_v38, %v1156_v42 }
 0x156   : > { %v1397_v50 = vadd.f32 %v2443_v29, %v1245_v43 }
 0x158   : > { %v1429_v53 = vmax.f32 %v1397_v50, 0.0 }
 0x159   : > { %v1157_v45 = vpop.f32.mrf.mxu2  ;;  %v982_v48 = vpop.f32.mrf.mxu0 }
 0x15a   : > { %v1246_v46 = vpop.f32.mrf.mxu3  ;;  %v1158_v47 = vadd.f32 %v1157_v45, %v1069_v44  ;;  %v1071_v49 = vpop.f32.mrf.mxu1 }
 0x15b   : > { %v1072_v55 = vadd.f32 %v1071_v49, %v982_v48 }
 0x15c   : > { %v1247_v51 = vadd.f32 %v1246_v46, %v1158_v47 }
 0x15e   : > { %v1398_v52 = vadd.f32 %v2443_v29, %v1247_v51 }
 0x160   : > { %v1430_v54 = vmax.f32 %v1398_v52, 0.0 }
 0x161   : > { %v1160_v56 = vpop.f32.mrf.mxu2  ;;  %v984_v59 = vpop.f32.mrf.mxu0 }
 0x162   : > { %v1249_v57 = vpop.f32.mrf.mxu3  ;;  %v2124_v58 = vpack.c.bf16 %v1430_v54, %v1429_v53  ;;  %v1073_v60 = vpop.f32.mrf.mxu1  ;;  %v1161_v61 = vadd.f32 %v1160_v56, %v1072_v55 }
 0x163   : > { %v1074_v63 = vadd.f32 %v1073_v60, %v984_v59 }
 0x164   : > { %2160 = vst [vmem:[%s2451_s21 + $0x50] sm:$0xff] %v2124_v58   ;;  %v1250_v62 = vadd.f32 %v1249_v57, %v1161_v61 }
 0x166   : > { %v1399_v5 = vadd.f32 %v2443_v29, %v1250_v62 }
 0x168   : > { %v1431_v8 = vmax.f32 %v1399_v5, 0.0 }
 0x169   : > { %v1162_v0 = vpop.f32.mrf.mxu2  ;;  %v987_v3 = vpop.f32.mrf.mxu0 }
 0x16a   : > { %v1251_v1 = vpop.f32.mrf.mxu3  ;;  %v1163_v2 = vadd.f32 %v1162_v0, %v1074_v63  ;;  %v1076_v4 = vpop.f32.mrf.mxu1 }
 0x16b   : > { %v1077_v10 = vadd.f32 %v1076_v4, %v987_v3 }
 0x16c   : > { %v1252_v6 = vadd.f32 %v1251_v1, %v1163_v2 }
 0x16e   : > { %v1400_v7 = vadd.f32 %v2443_v29, %v1252_v6 }
 0x170   : > { %v1432_v9 = vmax.f32 %v1400_v7, 0.0 }
 0x171   : > { %v1165_v11 = vpop.f32.mrf.mxu2  ;;  %v989_v14 = vpop.f32.mrf.mxu0 }
 0x172   : > { %v1254_v12 = vpop.f32.mrf.mxu3  ;;  %v2129_v13 = vpack.c.bf16 %v1432_v9, %v1431_v8  ;;  %v1078_v15 = vpop.f32.mrf.mxu1  ;;  %v1166_v16 = vadd.f32 %v1165_v11, %v1077_v10 }
 0x173   : > { %v1079_v18 = vadd.f32 %v1078_v15, %v989_v14 }
 0x174   : > { %2161 = vst [vmem:[%s2451_s21 + $0x58] sm:$0xff] %v2129_v13   ;;  %v1255_v17 = vadd.f32 %v1254_v12, %v1166_v16 }
 0x176   : > { %v1401_v24 = vadd.f32 %v2443_v29, %v1255_v17 }
 0x178   : > { %v1433_v27 = vmax.f32 %v1401_v24, 0.0 }
 0x179   : > { %v1167_v19 = vpop.f32.mrf.mxu2  ;;  %v992_v22 = vpop.f32.mrf.mxu0 }
 0x17a   : > { %v1256_v20 = vpop.f32.mrf.mxu3  ;;  %v1168_v21 = vadd.f32 %v1167_v19, %v1079_v18  ;;  %v1081_v23 = vpop.f32.mrf.mxu1 }
 0x17b   : > { %v1082_v30 = vadd.f32 %v1081_v23, %v992_v22 }
 0x17c   : > { %v1257_v25 = vadd.f32 %v1256_v20, %v1168_v21 }
 0x17e   : > { %v1402_v26 = vadd.f32 %v2443_v29, %v1257_v25 }
 0x180   : > { %v1434_v28 = vmax.f32 %v1402_v26, 0.0 }
 0x181   : > { %v1170_v31 = vpop.f32.mrf.mxu2  ;;  %v994_v34 = vpop.f32.mrf.mxu0 }
 0x182   : > { %v1259_v32 = vpop.f32.mrf.mxu3  ;;  %v2134_v33 = vpack.c.bf16 %v1434_v28, %v1433_v27  ;;  %v1083_v35 = vpop.f32.mrf.mxu1  ;;  %v1171_v36 = vadd.f32 %v1170_v31, %v1082_v30 }
 0x183   : > { %v1084_v38 = vadd.f32 %v1083_v35, %v994_v34 }
 0x184   : > { %2162 = vst [vmem:[%s2451_s21 + $0x60] sm:$0xff] %v2134_v33   ;;  %v1260_v37 = vadd.f32 %v1259_v32, %v1171_v36 }
 0x186   : > { %v1403_v44 = vadd.f32 %v2443_v29, %v1260_v37 }
 0x188   : > { %v1435_v47 = vmax.f32 %v1403_v44, 0.0 }
 0x189   : > { %v1172_v39 = vpop.f32.mrf.mxu2  ;;  %v997_v42 = vpop.f32.mrf.mxu0 }
 0x18a   : > { %v1261_v40 = vpop.f32.mrf.mxu3  ;;  %v1173_v41 = vadd.f32 %v1172_v39, %v1084_v38  ;;  %v1086_v43 = vpop.f32.mrf.mxu1 }
 0x18b   : > { %v1087_v49 = vadd.f32 %v1086_v43, %v997_v42 }
 0x18c   : > { %v1262_v45 = vadd.f32 %v1261_v40, %v1173_v41 }
 0x18e   : > { %v1404_v46 = vadd.f32 %v2443_v29, %v1262_v45 }
 0x190   : > { %v1436_v48 = vmax.f32 %v1404_v46, 0.0 }
 0x191   : > { %v1175_v50 = vpop.f32.mrf.mxu2  ;;  %v999_v53 = vpop.f32.mrf.mxu0 }
 0x192   : > { %v1264_v51 = vpop.f32.mrf.mxu3  ;;  %v2139_v52 = vpack.c.bf16 %v1436_v48, %v1435_v47  ;;  %v1088_v54 = vpop.f32.mrf.mxu1  ;;  %v1176_v55 = vadd.f32 %v1175_v50, %v1087_v49 }
 0x193   : > { %v1089_v57 = vadd.f32 %v1088_v54, %v999_v53 }
 0x194   : > { %2163 = vst [vmem:[%s2451_s21 + $0x68] sm:$0xff] %v2139_v52   ;;  %v1265_v56 = vadd.f32 %v1264_v51, %v1176_v55 }
 0x196   : > { %v1405_v63 = vadd.f32 %v2443_v29, %v1265_v56 }
 0x198   : > { %v1437_v2 = vmax.f32 %v1405_v63, 0.0 }
 0x199   : > { %v1177_v58 = vpop.f32.mrf.mxu2  ;;  %v1002_v61 = vpop.f32.mrf.mxu0 }
 0x19a   : > { %v1266_v59 = vpop.f32.mrf.mxu3  ;;  %v1178_v60 = vadd.f32 %v1177_v58, %v1089_v57  ;;  %v1091_v62 = vpop.f32.mrf.mxu1 }
 0x19b   : > { %v1092_v4 = vadd.f32 %v1091_v62, %v1002_v61 }
 0x19c   : > { %v1267_v0 = vadd.f32 %v1266_v59, %v1178_v60 }
 0x19e   : > { %v1406_v1 = vadd.f32 %v2443_v29, %v1267_v0 }
 0x1a0   : > { %v1438_v3 = vmax.f32 %v1406_v1, 0.0 }
 0x1a1   : > { %v1180_v5 = vpop.f32.mrf.mxu2  ;;  %v1004_v9 = vpop.f32.mrf.mxu0 }
 0x1a2   : > { %v1269_v6 = vpop.f32.mrf.mxu3  ;;  %v2144_v7 = vpack.c.bf16 %v1438_v3, %v1437_v2  ;;  %v1181_v8 = vadd.f32 %v1180_v5, %v1092_v4  ;;  %v1093_v10 = vpop.f32.mrf.mxu1 }
 0x1a3   : > { %v1094_v12 = vadd.f32 %v1093_v10, %v1004_v9 }
 0x1a4   : > { %2164 = vst [vmem:[%s2451_s21 + $0x70] sm:$0xff] %v2144_v7   ;;  %v1270_v11 = vadd.f32 %v1269_v6, %v1181_v8 }
 0x1a6   : > { %v1407_v16 = vadd.f32 %v2443_v29, %v1270_v11 }
 0x1a8   : > { %v1439_v19 = vmax.f32 %v1407_v16, 0.0 }
 0x1a9   : > { %v1182_v13 = vpop.f32.mrf.mxu2 }
 0x1aa   : > { %v1183_v14 = vadd.f32 %v1182_v13, %v1094_v12  ;;  %v1271_v15 = vpop.f32.mrf.mxu3 }
 0x1ac   : > { %v1272_v17 = vadd.f32 %v1271_v15, %v1183_v14 }
 0x1ae   : > { %v1408_v18 = vadd.f32 %v2443_v29, %v1272_v17 }
 0x1b0   : > { %v1440_v20 = vmax.f32 %v1408_v18, 0.0 }
 0x1b2   : > { %v2149_v21 = vpack.c.bf16 %v1440_v20, %v1439_v19 }
 0x1b4   : > { %2165 = vst [vmem:[%s2451_s21 + $0x78] sm:$0xff] %v2149_v21  }
 0x1b5 PF: > { %s13_s14 = sadd.s32 1, %s2213_s14   ;;  %s2560_s12 = smov %s2209_s13 }
 0x1b6   : > { %p10_p5 = scmp.ge.s32.totalorder %s13_s14, 4   ;;  %s2561_s13 = smov %s2563_s15 }
 0x1b8   :  { %12 = sbr.rel (!%p10_p5) target bundleno = 2 (0x2), region = 71 }

// kernel: gcn_forward.7
= control target key start
LH: loop header
LB: loop body
LE: loop exit
PB: predicated region body
PF: predicated region fallthrough
CT: control target
= control target key end

     0   :  { %s2077_s12 = smov 0   ;;  %s2079_s13 = smov 0   ;;  %s2414_s0 = inlined_call_operand.vmem [shape: bf16[512,512], index: 0, kind: input, shape index: {}]   ;;  %s2415_s1 = inlined_call_operand.vmem [shape: bf16[512,128], index: 1, kind: input, shape index: {}]   ;;  %s2416_s2 = inlined_call_operand.vmem [shape: f32[1,128], index: 2, kind: input, shape index: {}]   ;;  %s2417_s3 = inlined_call_operand.vmem [shape: f32[512,128], index: 3, kind: output, shape index: {}]  }
   0x1   :  { %s2081_s14 = smov 0  }
   0x2 LB: > { %s25_s15 = sadd.s32 1, %s2051_s13  ;;  %p1518_p0 = scmp.ge.s32.totalorder %s2055_s14, 1  ;;  %s2055_s14 = sphi %s2081_s14, %s13_s14   ;;  %s2051_s13 = sphi %s2079_s13, %s2419_s13   ;;  %s2047_s12 = sphi %s2077_s12, %s2418_s12  }
   0x3   : > { %p27_p1 = scmp.ge.s32.totalorder %s25_s15, 2  ;;  %p158_p2 = scmp.lt.s32.totalorder %s2055_s14, 3 }
   0x5   : > { %s2421_s15 = smov (%p27_p1, %s25_s15), 0  ;;  %p159_p3 = pnand %p1518_p0, %p158_p2 }
   0x6   : > { %s1519_s17 = sshll.u32 (!%p159_p3), %s2047_s12, 5 }
   0x7   : > { %162 = sbr.rel (%p159_p3) target bundleno = 433 (0x1b1), region = 32  ;;  %p189_p4 = scmp.lt.s32.totalorder (!%p159_p3), %s1519_s17, 63 }
   0xc   : > { %v1918_v0 = vld [vmem:[%s2415_s1 + $0x38] sm:$0xff]  ;;  %v1917_v4 = vld [vmem:[%s2415_s1 + $0x30] sm:$0xff]  ;;  %v1916_v8 = vld [vmem:[%s2415_s1 + $0x28] sm:$0xff]  ;;  %s2423_s17 = smov (!%p189_p4, %s1519_s17), 63 }
   0xd   : > { %v1926_v1 = vld [vmem:[%s2415_s1 + $0x78] sm:$0xff]  ;;  %918 = vmatpush.bf16.msra.mxu0 %v1918_v0  ;;  %v1925_v5 = vld [vmem:[%s2415_s1 + $0x70] sm:$0xff]  ;;  %v1924_v9 = vld [vmem:[%s2415_s1 + $0x68] sm:$0xff]  ;;  %s1910_s19 = sshll.u32 %s2423_s17, 4  ;;  %s1523_s11 = sshll.u32 %s2423_s17, 3 }
   0xe   : > { %v1934_v2 = vld [vmem:[%s2415_s1 + $0xb8] sm:$0xff]  ;;  %1007 = vmatpush.bf16.msra.mxu1 %v1926_v1  ;;  %v1933_v6 = vld [vmem:[%s2415_s1 + $0xb0] sm:$0xff]  ;;  %v1932_v10 = vld [vmem:[%s2415_s1 + $0xa8] sm:$0xff]  ;;  %s2182_s12 = scalar_lea.vmem %s2414_s0, %s1910_s19  ;;  %s2288_s21 = scalar_lea.vmem %s2417_s3, %s1523_s11 }
   0xf   : > { %v1942_v3 = vld [vmem:[%s2415_s1 + $0xf8] sm:$0xff]  ;;  %1096 = vmatpush.bf16.msra.mxu2 %v1934_v2  ;;  %v1941_v7 = vld [vmem:[%s2415_s1 + $0xf0] sm:$0xff]  ;;  %v1940_v11 = vld [vmem:[%s2415_s1 + $0xe8] sm:$0xff] }
  0x10   : > { %1185 = vmatpush.bf16.msra.mxu3 %v1942_v3  ;;  %v1915_v12 = vld [vmem:[%s2415_s1 + $0x20] sm:$0xff]  ;;  %v1914_v16 = vld [vmem:[%s2415_s1 + $0x18] sm:$0xff]  ;;  %v1913_v20 = vld [vmem:[%s2415_s1 + $0x10] sm:$0xff] }
  0x11   : > { %919 = vmatpush.bf16.msra.mxu0 %v1917_v4  ;;  %v1923_v13 = vld [vmem:[%s2415_s1 + $0x60] sm:$0xff]  ;;  %v1922_v17 = vld [vmem:[%s2415_s1 + $0x58] sm:$0xff]  ;;  %v1921_v21 = vld [vmem:[%s2415_s1 + $0x50] sm:$0xff] }
  0x12   : > { %1008 = vmatpush.bf16.msra.mxu1 %v1925_v5  ;;  %v1931_v14 = vld [vmem:[%s2415_s1 + $0xa0] sm:$0xff]  ;;  %v1930_v18 = vld [vmem:[%s2415_s1 + $0x98] sm:$0xff]  ;;  %v1929_v22 = vld [vmem:[%s2415_s1 + $0x90] sm:$0xff] }
  0x13   : > { %1097 = vmatpush.bf16.msra.mxu2 %v1933_v6  ;;  %v1939_v15 = vld [vmem:[%s2415_s1 + $0xe0] sm:$0xff]  ;;  %v1938_v19 = vld [vmem:[%s2415_s1 + $0xd8] sm:$0xff]  ;;  %v1937_v23 = vld [vmem:[%s2415_s1 + $0xd0] sm:$0xff] }
  0x14   : > { %1186 = vmatpush.bf16.msra.mxu3 %v1941_v7  ;;  %v1912_v24 = vld [vmem:[%s2415_s1 + $0x8] sm:$0xff]  ;;  %v1911_v28 = vld [vmem:[%s2415_s1] sm:$0xff]  ;;  %v1945_v33 = vld [vmem:[%s2182_s12 + $0xc] sm:$0xf0] }
  0x15   : > { %920 = vmatpush.bf16.msra.mxu0 %v1916_v8  ;;  %v1920_v25 = vld [vmem:[%s2415_s1 + $0x48] sm:$0xff]  ;;  %v1919_v29 = vld [vmem:[%s2415_s1 + $0x40] sm:$0xff]  ;;  %v1528_v35 = vld [vmem:[%s2182_s12 + $0x10] sm:$0xf0] }
  0x16   : > { %1009 = vmatpush.bf16.msra.mxu1 %v1924_v9  ;;  %v1928_v26 = vld [vmem:[%s2415_s1 + $0x88] sm:$0xff]  ;;  %v1927_v30 = vld [vmem:[%s2415_s1 + $0x80] sm:$0xff]  ;;  %v1946_v37 = vld [vmem:[%s2182_s12 + $0x14] sm:$0xf0] }
  0x17   : > { %1098 = vmatpush.bf16.msra.mxu2 %v1932_v10  ;;  %v1936_v27 = vld [vmem:[%s2415_s1 + $0xc8] sm:$0xff]  ;;  %v1935_v31 = vld [vmem:[%s2415_s1 + $0xc0] sm:$0xff]  ;;  %v1536_v39 = vld [vmem:[%s2182_s12 + $0x18] sm:$0xf0] }
  0x18   : > { %1187 = vmatpush.bf16.msra.mxu3 %v1940_v11  ;;  %v1526_v32 = vld [vmem:[%s2182_s12] sm:$0xf]  ;;  %v1943_v34 = vld [vmem:[%s2182_s12 + $0x4] sm:$0xf]  ;;  %v1534_v36 = vld [vmem:[%s2182_s12 + $0x8] sm:$0xf] }
  0x19   : > { %921 = vmatpush.bf16.msra.mxu0 %v1915_v12  ;;  %v1944_v38 = vld [vmem:[%s2182_s12 + $0xc] sm:$0xf]  ;;  %v1527_v40 = vor.u32 %v1945_v33, %v1526_v32  ;;  %v1531_v41 = vor.u32 %v1943_v34, %v1528_v35  ;;  %v1535_v42 = vor.u32 %v1946_v37, %v1534_v36  ;;  %v1542_v44 = vld [vmem:[%s2182_s12 + $0x20] sm:$0xf]  ;;  %v1949_v45 = vld [vmem:[%s2182_s12 + $0x2c] sm:$0xf0] }
  0x1a   : > { %1010 = vmatpush.bf16.msra.mxu1 %v1923_v13  ;;  %v1539_v43 = vor.u32 %v1944_v38, %v1536_v39  ;;  %v1947_v46 = vld [vmem:[%s2182_s12 + $0x24] sm:$0xf]  ;;  %v1544_v47 = vld [vmem:[%s2182_s12 + $0x30] sm:$0xf0]  ;;  %v1550_v48 = vld [vmem:[%s2182_s12 + $0x28] sm:$0xf]  ;;  %v1543_v52 = vor.u32 %v1949_v45, %v1542_v44 }
  0x1b   : > { %1099 = vmatpush.bf16.msra.mxu2 %v1931_v14  ;;  %v1950_v49 = vld [vmem:[%s2182_s12 + $0x34] sm:$0xf0]  ;;  %v1948_v50 = vld [vmem:[%s2182_s12 + $0x2c] sm:$0xf]  ;;  %v1552_v51 = vld [vmem:[%s2182_s12 + $0x38] sm:$0xf0]  ;;  %v1547_v53 = vor.u32 %v1947_v46, %v1544_v47 }
  0x1c   : > { %1188 = vmatpush.bf16.msra.mxu3 %v1939_v15  ;;  %v1551_v54 = vor.u32 %v1950_v49, %v1550_v48  ;;  %v1555_v55 = vor.u32 %v1948_v50, %v1552_v51  ;;  %v1558_v56 = vld [vmem:[%s2182_s12 + $0x40] sm:$0xf]  ;;  %v1953_v57 = vld [vmem:[%s2182_s12 + $0x4c] sm:$0xf0]  ;;  %v1951_v58 = vld [vmem:[%s2182_s12 + $0x44] sm:$0xf] }
  0x1d   : > { %922 = vmatpush.bf16.msra.mxu0 %v1914_v16  ;;  %v1560_v59 = vld [vmem:[%s2182_s12 + $0x50] sm:$0xf0]  ;;  %v1566_v60 = vld [vmem:[%s2182_s12 + $0x48] sm:$0xf]  ;;  %v1954_v61 = vld [vmem:[%s2182_s12 + $0x54] sm:$0xf0]  ;;  %v1559_v0 = vor.u32 %v1953_v57, %v1558_v56 }
  0x1e   : > { %1011 = vmatpush.bf16.msra.mxu1 %v1922_v17  ;;  %v1952_v62 = vld [vmem:[%s2182_s12 + $0x4c] sm:$0xf]  ;;  %v1568_v63 = vld [vmem:[%s2182_s12 + $0x58] sm:$0xf0]  ;;  %v1563_v1 = vor.u32 %v1951_v58, %v1560_v59  ;;  %v1567_v2 = vor.u32 %v1954_v61, %v1566_v60  ;;  %v1574_v4 = vld [vmem:[%s2182_s12 + $0x60] sm:$0xf] }
  0x1f   : > { %1100 = vmatpush.bf16.msra.mxu2 %v1930_v18  ;;  %v1571_v3 = vor.u32 %v1952_v62, %v1568_v63  ;;  %v1957_v5 = vld [vmem:[%s2182_s12 + $0x6c] sm:$0xf0]  ;;  %v1955_v6 = vld [vmem:[%s2182_s12 + $0x64] sm:$0xf]  ;;  %v1576_v7 = vld [vmem:[%s2182_s12 + $0x70] sm:$0xf0] }
  0x20   : > { %1189 = vmatpush.bf16.msra.mxu3 %v1938_v19  ;;  %v1582_v8 = vld [vmem:[%s2182_s12 + $0x68] sm:$0xf]  ;;  %v1958_v9 = vld [vmem:[%s2182_s12 + $0x74] sm:$0xf0]  ;;  %v1956_v10 = vld [vmem:[%s2182_s12 + $0x6c] sm:$0xf]  ;;  %v1575_v12 = vor.u32 %v1957_v5, %v1574_v4  ;;  %v1579_v13 = vor.u32 %v1955_v6, %v1576_v7 }
  0x21   : > { %923 = vmatpush.bf16.msra.mxu0 %v1913_v20  ;;  %v1584_v11 = vld [vmem:[%s2182_s12 + $0x78] sm:$0xf0]  ;;  %v1583_v14 = vor.u32 %v1958_v9, %v1582_v8  ;;  %v1590_v16 = vld [vmem:[%s2182_s12 + $0x80] sm:$0xf]  ;;  %v1961_v17 = vld [vmem:[%s2182_s12 + $0x8c] sm:$0xf0] }
  0x22   : > { %1012 = vmatpush.bf16.msra.mxu1 %v1921_v21  ;;  %v1587_v15 = vor.u32 %v1956_v10, %v1584_v11  ;;  %v1959_v18 = vld [vmem:[%s2182_s12 + $0x84] sm:$0xf]  ;;  %v1592_v19 = vld [vmem:[%s2182_s12 + $0x90] sm:$0xf0]  ;;  %v1598_v20 = vld [vmem:[%s2182_s12 + $0x88] sm:$0xf] }
  0x23   : > { %1101 = vmatpush.bf16.msra.mxu2 %v1929_v22  ;;  %v1962_v21 = vld [vmem:[%s2182_s12 + $0x94] sm:$0xf0]  ;;  %v1960_v22 = vld [vmem:[%s2182_s12 + $0x8c] sm:$0xf]  ;;  %v1614_v32 = vld [vmem:[%s2182_s12 + $0xa8] sm:$0xf] }
  0x24   : > { %1190 = vmatpush.bf16.msra.mxu3 %v1937_v23  ;;  %v1600_v23 = vld [vmem:[%s2182_s12 + $0x98] sm:$0xf0]  ;;  %v1966_v33 = vld [vmem:[%s2182_s12 + $0xb4] sm:$0xf0]  ;;  %v1964_v34 = vld [vmem:[%s2182_s12 + $0xac] sm:$0xf] }
  0x25   : > { %924 = vmatpush.bf16.msra.mxu0 %v1912_v24  ;;  %v1591_v24 = vor.u32 %v1961_v17, %v1590_v16  ;;  %v1616_v35 = vld [vmem:[%s2182_s12 + $0xb8] sm:$0xf0]  ;;  %v1615_v38 = vor.u32 %v1966_v33, %v1614_v32  ;;  %v1630_v44 = vld [vmem:[%s2182_s12 + $0xc8] sm:$0xf]  ;;  %v1970_v45 = vld [vmem:[%s2182_s12 + $0xd4] sm:$0xf0] }
  0x26   : > { %1013 = vmatpush.bf16.msra.mxu1 %v1920_v25  ;;  %v1595_v25 = vor.u32 %v1959_v18, %v1592_v19  ;;  %v1619_v39 = vor.u32 %v1964_v34, %v1616_v35  ;;  %v1968_v46 = vld [vmem:[%s2182_s12 + $0xcc] sm:$0xf]  ;;  %v1632_v47 = vld [vmem:[%s2182_s12 + $0xd8] sm:$0xf0]  ;;  %v1631_v50 = vor.u32 %v1970_v45, %v1630_v44  ;;  %v1646_v56 = vld [vmem:[%s2182_s12 + $0xe8] sm:$0xf] }
  0x27   : > { %1102 = vmatpush.bf16.msra.mxu2 %v1928_v26  ;;  %v1599_v26 = vor.u32 %v1962_v21, %v1598_v20  ;;  %v1635_v51 = vor.u32 %v1968_v46, %v1632_v47  ;;  %v1974_v57 = vld [vmem:[%s2182_s12 + $0xf4] sm:$0xf0]  ;;  %v1972_v58 = vld [vmem:[%s2182_s12 + $0xec] sm:$0xf]  ;;  %v1648_v59 = vld [vmem:[%s2182_s12 + $0xf8] sm:$0xf0] }
  0x28   : > { %1191 = vmatpush.bf16.msra.mxu3 %v1936_v27  ;;  %v1603_v27 = vor.u32 %v1960_v22, %v1600_v23  ;;  %v1647_v62 = vor.u32 %v1974_v57, %v1646_v56  ;;  %v1651_v63 = vor.u32 %v1972_v58, %v1648_v59  ;;  %v1662_v4 = vld [vmem:[%s2182_s12 + $0x108] sm:$0xf]  ;;  %v1978_v5 = vld [vmem:[%s2182_s12 + $0x114] sm:$0xf0]  ;;  %v1976_v6 = vld [vmem:[%s2182_s12 + $0x10c] sm:$0xf] }
  0x29   : > { %925 = vmatpush.bf16.msra.mxu0 %v1911_v28  ;;  %v1606_v28 = vld [vmem:[%s2182_s12 + $0xa0] sm:$0xf]  ;;  %v1664_v7 = vld [vmem:[%s2182_s12 + $0x118] sm:$0xf0]  ;;  %v1981_v23 = vld [vmem:[%s2182_s12 + $0x12c] sm:$0xf0] }
  0x2a   : > { %1014 = vmatpush.bf16.msra.mxu1 %v1919_v29  ;;  %v1965_v29 = vld [vmem:[%s2182_s12 + $0xac] sm:$0xf0]  ;;  %v2278_v21 = vld [vmem:[%s2416_s2] ss:$0 sm:$0xff]  ;;  %v1984_v56 = vld [vmem:[%s2182_s12 + $0x14c] sm:$0xf] }
  0x2b   : > { %1103 = vmatpush.bf16.msra.mxu2 %v1927_v30  ;;  %v1963_v30 = vld [vmem:[%s2182_s12 + $0xa4] sm:$0xf]  ;;  %v1607_v36 = vor.u32 %v1965_v29, %v1606_v28  ;;  %v1670_v22 = vld [vmem:[%s2182_s12 + $0x120] sm:$0xf]  ;;  %v1980_v28 = vld [vmem:[%s2182_s12 + $0x12c] sm:$0xf] }
  0x2c   : > { %1192 = vmatpush.bf16.msra.mxu3 %v1935_v31  ;;  %926 = vmatmul.bf16.vlgmr.msra.gmra.mxu0 %v1527_v40  ;;  %v1608_v31 = vld [vmem:[%s2182_s12 + $0xb0] sm:$0xf0]  ;;  %v1622_v40 = vld [vmem:[%s2182_s12 + $0xc0] sm:$0xf]  ;;  %v1680_v29 = vld [vmem:[%s2182_s12 + $0x138] sm:$0xf0]  ;;  %v1671_v34 = vor.u32 %v1981_v23, %v1670_v22 }
  0x2d   : > { %1015 = vmatmul.bf16.vlgmr.msra.gmra.mxu1 %v1531_v41  ;;  %v1611_v37 = vor.u32 %v1963_v30, %v1608_v31  ;;  %v1969_v41 = vld [vmem:[%s2182_s12 + $0xcc] sm:$0xf0]  ;;  %v1696_v57 = vld [vmem:[%s2182_s12 + $0x158] sm:$0xf0] }
  0x2e   : > { %1104 = vmatmul.bf16.vlgmr.msra.gmra.mxu2 %v1535_v42  ;;  %v1967_v42 = vld [vmem:[%s2182_s12 + $0xc4] sm:$0xf]  ;;  %v1623_v48 = vor.u32 %v1969_v41, %v1622_v40  ;;  %v1683_v40 = vor.u32 %v1980_v28, %v1680_v29  ;;  %v1712_v22 = vld [vmem:[%s2182_s12 + $0x178] sm:$0xf0] }
  0x2f   : > { %1193 = vmatmul.bf16.vlgmr.msra.gmra.mxu3 %v1539_v43  ;;  %v1624_v43 = vld [vmem:[%s2182_s12 + $0xd0] sm:$0xf0] }
  0x30   : > { %v1627_v49 = vor.u32 %v1967_v42, %v1624_v43 }
  0x3c   : > { %931 = vmatmul.bf16.gmra.mxu0 %v1543_v52  ;;  %v1638_v52 = vld [vmem:[%s2182_s12 + $0xe0] sm:$0xf] }
  0x3d   : > { %1020 = vmatmul.bf16.gmra.mxu1 %v1547_v53  ;;  %v1973_v53 = vld [vmem:[%s2182_s12 + $0xec] sm:$0xf0] }
  0x3e   : > { %1109 = vmatmul.bf16.gmra.mxu2 %v1551_v54  ;;  %v1971_v54 = vld [vmem:[%s2182_s12 + $0xe4] sm:$0xf]  ;;  %v1639_v60 = vor.u32 %v1973_v53, %v1638_v52  ;;  %v1688_v53 = vld [vmem:[%s2182_s12 + $0x150] sm:$0xf0] }
  0x3f   : > { %1198 = vmatmul.bf16.gmra.mxu3 %v1555_v55  ;;  %v1640_v55 = vld [vmem:[%s2182_s12 + $0xf0] sm:$0xf0]  ;;  %v1983_v52 = vld [vmem:[%s2182_s12 + $0x144] sm:$0xf] }
  0x40   : > { %v1643_v61 = vor.u32 %v1971_v54, %v1640_v55  ;;  %v1694_v54 = vld [vmem:[%s2182_s12 + $0x148] sm:$0xf]  ;;  %v1986_v55 = vld [vmem:[%s2182_s12 + $0x154] sm:$0xf0] }
  0x4c   : > { %936 = vmatmul.bf16.gmra.mxu0 %v1559_v0  ;;  %v1654_v0 = vld [vmem:[%s2182_s12 + $0x100] sm:$0xf] }
  0x4d   : > { %1025 = vmatmul.bf16.gmra.mxu1 %v1563_v1  ;;  %v1977_v1 = vld [vmem:[%s2182_s12 + $0x10c] sm:$0xf0] }
  0x4e   : > { %1114 = vmatmul.bf16.gmra.mxu2 %v1567_v2  ;;  %v1975_v2 = vld [vmem:[%s2182_s12 + $0x104] sm:$0xf]  ;;  %v1655_v8 = vor.u32 %v1977_v1, %v1654_v0 }
  0x4f   : > { %1203 = vmatmul.bf16.gmra.mxu3 %v1571_v3  ;;  %v1656_v3 = vld [vmem:[%s2182_s12 + $0x110] sm:$0xf0] }
  0x50   : > { %v1659_v9 = vor.u32 %v1975_v2, %v1656_v3  ;;  %v1695_v3 = vor.u32 %v1986_v55, %v1694_v54 }
  0x5c   : > { %941 = vmatmul.bf16.gmra.mxu0 %v1575_v12  ;;  %v1663_v12 = vor.u32 %v1978_v5, %v1662_v4  ;;  %v1699_v4 = vor.u32 %v1984_v56, %v1696_v57 }
  0x5d   : > { %1030 = vmatmul.bf16.gmra.mxu1 %v1579_v13  ;;  %v1667_v13 = vor.u32 %v1976_v6, %v1664_v7 }
  0x5e   : > { %1119 = vmatmul.bf16.gmra.mxu2 %v1583_v14 }
  0x5f   : > { %1208 = vmatmul.bf16.gmra.mxu3 %v1587_v15 }
  0x6c   : > { %946 = vmatmul.bf16.gmra.mxu0 %v1591_v24  ;;  %v1979_v24 = vld [vmem:[%s2182_s12 + $0x124] sm:$0xf] }
  0x6d   : > { %1035 = vmatmul.bf16.gmra.mxu1 %v1595_v25  ;;  %v1672_v25 = vld [vmem:[%s2182_s12 + $0x130] sm:$0xf0] }
  0x6e   : > { %1124 = vmatmul.bf16.gmra.mxu2 %v1599_v26  ;;  %v1678_v26 = vld [vmem:[%s2182_s12 + $0x128] sm:$0xf]  ;;  %v1675_v35 = vor.u32 %v1979_v24, %v1672_v25 }
  0x6f   : > { %1213 = vmatmul.bf16.gmra.mxu3 %v1603_v27  ;;  %v1982_v27 = vld [vmem:[%s2182_s12 + $0x134] sm:$0xf0] }
  0x7c   : > { %951 = vmatmul.bf16.gmra.mxu0 %v1607_v36 }
  0x7d   : > { %1040 = vmatmul.bf16.gmra.mxu1 %v1611_v37 }
  0x7e   : > { %1129 = vmatmul.bf16.gmra.mxu2 %v1615_v38 }
  0x7f   : > { %1218 = vmatmul.bf16.gmra.mxu3 %v1619_v39  ;;  %v1679_v39 = vor.u32 %v1982_v27, %v1678_v26 }
  0x8c   : > { %956 = vmatmul.bf16.gmra.mxu0 %v1623_v48 }
  0x8d   : > { %1045 = vmatmul.bf16.gmra.mxu1 %v1627_v49 }
  0x8e   : > { %1134 = vmatmul.bf16.gmra.mxu2 %v1631_v50  ;;  %v1686_v50 = vld [vmem:[%s2182_s12 + $0x140] sm:$0xf] }
  0x8f   : > { %1223 = vmatmul.bf16.gmra.mxu3 %v1635_v51  ;;  %v1985_v51 = vld [vmem:[%s2182_s12 + $0x14c] sm:$0xf0] }
  0x9c   : > { %961 = vmatmul.bf16.gmra.mxu0 %v1639_v60 }
  0x9d   : > { %1050 = vmatmul.bf16.gmra.mxu1 %v1643_v61 }
  0x9e   : > { %1139 = vmatmul.bf16.gmra.mxu2 %v1647_v62  ;;  %v1687_v62 = vor.u32 %v1985_v51, %v1686_v50  ;;  %v1728_v50 = vld [vmem:[%s2182_s12 + $0x198] sm:$0xf0] }
  0x9f   : > { %1228 = vmatmul.bf16.gmra.mxu3 %v1651_v63  ;;  %v1691_v63 = vor.u32 %v1983_v52, %v1688_v53 }
  0xa9   : > { %v927_v10 = vpop.f32.mrf.mxu0 }
  0xaa   : > { %v1016_v11 = vpop.f32.mrf.mxu1 }
  0xab   : > { %v1017_v14 = vadd.f32 %v1016_v11, %v927_v10 }
  0xac   : > { %966 = vmatmul.bf16.gmra.mxu0 %v1655_v8 }
  0xad   : > { %1055 = vmatmul.bf16.gmra.mxu1 %v1659_v9 }
  0xae   : > { %1144 = vmatmul.bf16.gmra.mxu2 %v1663_v12 }
  0xaf   : > { %1233 = vmatmul.bf16.gmra.mxu3 %v1667_v13 }
  0xb1   : > { %v1105_v15 = vpop.f32.mrf.mxu2  ;;  %v929_v18 = vpop.f32.mrf.mxu0 }
  0xb2   : > { %v1194_v16 = vpop.f32.mrf.mxu3  ;;  %v1106_v17 = vadd.f32 %v1105_v15, %v1017_v14  ;;  %v1018_v19 = vpop.f32.mrf.mxu1  ;;  %v1702_v14 = vld [vmem:[%s2182_s12 + $0x160] sm:$0xf]  ;;  %v1989_v15 = vld [vmem:[%s2182_s12 + $0x16c] sm:$0xf0] }
  0xb3   : > { %v1019_v31 = vadd.f32 %v1018_v19, %v929_v18  ;;  %v1710_v18 = vld [vmem:[%s2182_s12 + $0x168] sm:$0xf]  ;;  %v1990_v19 = vld [vmem:[%s2182_s12 + $0x174] sm:$0xf0]  ;;  %v1703_v27 = vor.u32 %v1989_v15, %v1702_v14  ;;  %v1744_v14 = vld [vmem:[%s2182_s12 + $0x1b8] sm:$0xf0] }
  0xb4   : > { %v1195_v20 = vadd.f32 %v1194_v16, %v1106_v17  ;;  %v1987_v16 = vld [vmem:[%s2182_s12 + $0x164] sm:$0xf]  ;;  %v1704_v17 = vld [vmem:[%s2182_s12 + $0x170] sm:$0xf0] }
  0xb5   : > { %v1707_v28 = vor.u32 %v1987_v16, %v1704_v17 }
  0xb6   : > { %v1377_v30 = vadd.f32 %v2278_v21, %v1195_v20  ;;  %v1988_v20 = vld [vmem:[%s2182_s12 + $0x16c] sm:$0xf] }
  0xb8   : > { %1409 = vst [vmem:[%s2288_s21] sm:$0xff] %v1377_v30 }
  0xb9   : > { %v1107_v32 = vpop.f32.mrf.mxu2  ;;  %v932_v37 = vpop.f32.mrf.mxu0 }
  0xba   : > { %v1196_v33 = vpop.f32.mrf.mxu3  ;;  %v1108_v36 = vadd.f32 %v1107_v32, %v1019_v31  ;;  %v1021_v38 = vpop.f32.mrf.mxu1  ;;  %v1711_v32 = vor.u32 %v1990_v19, %v1710_v18 }
  0xbb   : > { %v1022_v42 = vadd.f32 %v1021_v38, %v932_v37 }
  0xbc   : > { %v1197_v41 = vadd.f32 %v1196_v33, %v1108_v36  ;;  %971 = vmatmul.bf16.gmra.mxu0 %v1671_v34  ;;  %v1715_v33 = vor.u32 %v1988_v20, %v1712_v22 }
  0xbd   : > { %1060 = vmatmul.bf16.gmra.mxu1 %v1675_v35 }
  0xbe   : > { %1149 = vmatmul.bf16.gmra.mxu2 %v1679_v39  ;;  %v1378_v43 = vadd.f32 %v2278_v21, %v1197_v41 }
  0xbf   : > { %1238 = vmatmul.bf16.gmra.mxu3 %v1683_v40 }
  0xc0   : > { %1410 = vst [vmem:[%s2288_s21 + $0x8] sm:$0xff] %v1378_v43  ;;  %v1718_v43 = vld [vmem:[%s2182_s12 + $0x180] sm:$0xf] }
  0xc1   : > { %v1110_v44 = vpop.f32.mrf.mxu2  ;;  %v934_v47 = vpop.f32.mrf.mxu0 }
  0xc2   : > { %v1199_v45 = vpop.f32.mrf.mxu3  ;;  %v1111_v46 = vadd.f32 %v1110_v44, %v1022_v42  ;;  %v1023_v48 = vpop.f32.mrf.mxu1  ;;  %v1993_v44 = vld [vmem:[%s2182_s12 + $0x18c] sm:$0xf0] }
  0xc3   : > { %v1024_v59 = vadd.f32 %v1023_v48, %v934_v47  ;;  %v1726_v47 = vld [vmem:[%s2182_s12 + $0x188] sm:$0xf]  ;;  %v1994_v48 = vld [vmem:[%s2182_s12 + $0x194] sm:$0xf0]  ;;  %v1719_v55 = vor.u32 %v1993_v44, %v1718_v43  ;;  %v1760_v43 = vld [vmem:[%s2182_s12 + $0x1d8] sm:$0xf0] }
  0xc4   : > { %v1200_v49 = vadd.f32 %v1199_v45, %v1111_v46  ;;  %v1991_v45 = vld [vmem:[%s2182_s12 + $0x184] sm:$0xf]  ;;  %v1720_v46 = vld [vmem:[%s2182_s12 + $0x190] sm:$0xf0] }
  0xc5   : > { %v1723_v56 = vor.u32 %v1991_v45, %v1720_v46 }
  0xc6   : > { %v1379_v58 = vadd.f32 %v2278_v21, %v1200_v49  ;;  %v1992_v49 = vld [vmem:[%s2182_s12 + $0x18c] sm:$0xf] }
  0xc8   : > { %1411 = vst [vmem:[%s2288_s21 + $0x10] sm:$0xff] %v1379_v58 }
  0xc9   : > { %v1112_v60 = vpop.f32.mrf.mxu2  ;;  %v937_v1 = vpop.f32.mrf.mxu0 }
  0xca   : > { %v1201_v61 = vpop.f32.mrf.mxu3  ;;  %v1113_v0 = vadd.f32 %v1112_v60, %v1024_v59  ;;  %v1026_v2 = vpop.f32.mrf.mxu1  ;;  %v1727_v60 = vor.u32 %v1994_v48, %v1726_v47 }
  0xcb   : > { %v1027_v6 = vadd.f32 %v1026_v2, %v937_v1 }
  0xcc   : > { %v1202_v5 = vadd.f32 %v1201_v61, %v1113_v0  ;;  %976 = vmatmul.bf16.gmra.mxu0 %v1687_v62  ;;  %v1731_v61 = vor.u32 %v1992_v49, %v1728_v50 }
  0xcd   : > { %1065 = vmatmul.bf16.gmra.mxu1 %v1691_v63 }
  0xce   : > { %1154 = vmatmul.bf16.gmra.mxu2 %v1695_v3  ;;  %v1380_v7 = vadd.f32 %v2278_v21, %v1202_v5 }
  0xcf   : > { %1243 = vmatmul.bf16.gmra.mxu3 %v1699_v4 }
  0xd0   : > { %1412 = vst [vmem:[%s2288_s21 + $0x18] sm:$0xff] %v1380_v7  ;;  %v1734_v7 = vld [vmem:[%s2182_s12 + $0x1a0] sm:$0xf] }
  0xd1   : > { %v1115_v8 = vpop.f32.mrf.mxu2  ;;  %v939_v11 = vpop.f32.mrf.mxu0 }
  0xd2   : > { %v1204_v9 = vpop.f32.mrf.mxu3  ;;  %v1116_v10 = vadd.f32 %v1115_v8, %v1027_v6  ;;  %v1028_v12 = vpop.f32.mrf.mxu1  ;;  %v1997_v8 = vld [vmem:[%s2182_s12 + $0x1ac] sm:$0xf0] }
  0xd3   : > { %v1029_v24 = vadd.f32 %v1028_v12, %v939_v11  ;;  %v1742_v11 = vld [vmem:[%s2182_s12 + $0x1a8] sm:$0xf]  ;;  %v1998_v12 = vld [vmem:[%s2182_s12 + $0x1b4] sm:$0xf0]  ;;  %v1735_v19 = vor.u32 %v1997_v8, %v1734_v7  ;;  %v1776_v7 = vld [vmem:[%s2182_s12 + $0x1f8] sm:$0xf0] }
  0xd4   : > { %v1205_v13 = vadd.f32 %v1204_v9, %v1116_v10  ;;  %v1995_v9 = vld [vmem:[%s2182_s12 + $0x1a4] sm:$0xf]  ;;  %v1736_v10 = vld [vmem:[%s2182_s12 + $0x1b0] sm:$0xf0] }
  0xd5   : > { %v1739_v20 = vor.u32 %v1995_v9, %v1736_v10 }
  0xd6   : > { %v1381_v23 = vadd.f32 %v2278_v21, %v1205_v13  ;;  %v1996_v13 = vld [vmem:[%s2182_s12 + $0x1ac] sm:$0xf] }
  0xd8   : > { %1413 = vst [vmem:[%s2288_s21 + $0x20] sm:$0xff] %v1381_v23 }
  0xd9   : > { %v1117_v25 = vpop.f32.mrf.mxu2  ;;  %v942_v30 = vpop.f32.mrf.mxu0 }
  0xda   : > { %v1206_v26 = vpop.f32.mrf.mxu3  ;;  %v1118_v29 = vadd.f32 %v1117_v25, %v1029_v24  ;;  %v1031_v31 = vpop.f32.mrf.mxu1  ;;  %v1743_v25 = vor.u32 %v1998_v12, %v1742_v11 }
  0xdb   : > { %v1032_v35 = vadd.f32 %v1031_v31, %v942_v30 }
  0xdc   : > { %v1207_v34 = vadd.f32 %v1206_v26, %v1118_v29  ;;  %981 = vmatmul.bf16.gmra.mxu0 %v1703_v27  ;;  %v1747_v26 = vor.u32 %v1996_v13, %v1744_v14 }
  0xdd   : > { %1070 = vmatmul.bf16.gmra.mxu1 %v1707_v28 }
  0xde   : > { %1159 = vmatmul.bf16.gmra.mxu2 %v1711_v32  ;;  %v1382_v36 = vadd.f32 %v2278_v21, %v1207_v34 }
  0xdf   : > { %1248 = vmatmul.bf16.gmra.mxu3 %v1715_v33 }
  0xe0   : > { %1414 = vst [vmem:[%s2288_s21 + $0x28] sm:$0xff] %v1382_v36  ;;  %v1750_v36 = vld [vmem:[%s2182_s12 + $0x1c0] sm:$0xf] }
  0xe1   : > { %v1120_v37 = vpop.f32.mrf.mxu2  ;;  %v944_v40 = vpop.f32.mrf.mxu0 }
  0xe2   : > { %v1209_v38 = vpop.f32.mrf.mxu3  ;;  %v1121_v39 = vadd.f32 %v1120_v37, %v1032_v35  ;;  %v1033_v41 = vpop.f32.mrf.mxu1  ;;  %v2001_v37 = vld [vmem:[%s2182_s12 + $0x1cc] sm:$0xf0] }
  0xe3   : > { %v1034_v52 = vadd.f32 %v1033_v41, %v944_v40  ;;  %v1758_v40 = vld [vmem:[%s2182_s12 + $0x1c8] sm:$0xf]  ;;  %v2002_v41 = vld [vmem:[%s2182_s12 + $0x1d4] sm:$0xf0]  ;;  %v1751_v48 = vor.u32 %v2001_v37, %v1750_v36 }
  0xe4   : > { %v1210_v42 = vadd.f32 %v1209_v38, %v1121_v39  ;;  %v1999_v38 = vld [vmem:[%s2182_s12 + $0x1c4] sm:$0xf]  ;;  %v1752_v39 = vld [vmem:[%s2182_s12 + $0x1d0] sm:$0xf0] }
  0xe5   : > { %v1755_v49 = vor.u32 %v1999_v38, %v1752_v39 }
  0xe6   : > { %v1383_v51 = vadd.f32 %v2278_v21, %v1210_v42  ;;  %v2000_v42 = vld [vmem:[%s2182_s12 + $0x1cc] sm:$0xf] }
  0xe8   : > { %1415 = vst [vmem:[%s2288_s21 + $0x30] sm:$0xff] %v1383_v51 }
  0xe9   : > { %v1122_v53 = vpop.f32.mrf.mxu2  ;;  %v947_v58 = vpop.f32.mrf.mxu0 }
  0xea   : > { %v1211_v54 = vpop.f32.mrf.mxu3  ;;  %v1123_v57 = vadd.f32 %v1122_v53, %v1034_v52  ;;  %v1036_v59 = vpop.f32.mrf.mxu1  ;;  %v1759_v53 = vor.u32 %v2002_v41, %v1758_v40 }
  0xeb   : > { %v1037_v63 = vadd.f32 %v1036_v59, %v947_v58 }
  0xec   : > { %v1212_v62 = vadd.f32 %v1211_v54, %v1123_v57  ;;  %986 = vmatmul.bf16.gmra.mxu0 %v1719_v55  ;;  %v1763_v54 = vor.u32 %v2000_v42, %v1760_v43 }
  0xed   : > { %1075 = vmatmul.bf16.gmra.mxu1 %v1723_v56 }
  0xee   : > { %1164 = vmatmul.bf16.gmra.mxu2 %v1727_v60  ;;  %v1384_v0 = vadd.f32 %v2278_v21, %v1212_v62 }
  0xef   : > { %1253 = vmatmul.bf16.gmra.mxu3 %v1731_v61 }
  0xf0   : > { %1416 = vst [vmem:[%s2288_s21 + $0x38] sm:$0xff] %v1384_v0  ;;  %v1766_v0 = vld [vmem:[%s2182_s12 + $0x1e0] sm:$0xf] }
  0xf1   : > { %v1125_v1 = vpop.f32.mrf.mxu2  ;;  %v949_v4 = vpop.f32.mrf.mxu0 }
  0xf2   : > { %v1214_v2 = vpop.f32.mrf.mxu3  ;;  %v1126_v3 = vadd.f32 %v1125_v1, %v1037_v63  ;;  %v1038_v5 = vpop.f32.mrf.mxu1  ;;  %v2005_v1 = vld [vmem:[%s2182_s12 + $0x1ec] sm:$0xf0] }
  0xf3   : > { %v1039_v16 = vadd.f32 %v1038_v5, %v949_v4  ;;  %v1774_v4 = vld [vmem:[%s2182_s12 + $0x1e8] sm:$0xf]  ;;  %v2006_v5 = vld [vmem:[%s2182_s12 + $0x1f4] sm:$0xf0]  ;;  %v1767_v12 = vor.u32 %v2005_v1, %v1766_v0 }
  0xf4   : > { %v1215_v6 = vadd.f32 %v1214_v2, %v1126_v3  ;;  %v2003_v2 = vld [vmem:[%s2182_s12 + $0x1e4] sm:$0xf]  ;;  %v1768_v3 = vld [vmem:[%s2182_s12 + $0x1f0] sm:$0xf0] }
  0xf5   : > { %v1771_v13 = vor.u32 %v2003_v2, %v1768_v3 }
  0xf6   : > { %v1385_v15 = vadd.f32 %v2278_v21, %v1215_v6  ;;  %v2004_v6 = vld [vmem:[%s2182_s12 + $0x1ec] sm:$0xf] }
  0xf8   : > { %1417 = vst [vmem:[%s2288_s21 + $0x40] sm:$0xff] %v1385_v15 }
  0xf9   : > { %v1127_v17 = vpop.f32.mrf.mxu2  ;;  %v952_v23 = vpop.f32.mrf.mxu0 }
  0xfa   : > { %v1216_v18 = vpop.f32.mrf.mxu3  ;;  %v1128_v22 = vadd.f32 %v1127_v17, %v1039_v16  ;;  %v1041_v24 = vpop.f32.mrf.mxu1  ;;  %v1775_v17 = vor.u32 %v2006_v5, %v1774_v4 }
  0xfb   : > { %v1042_v28 = vadd.f32 %v1041_v24, %v952_v23 }
  0xfc   : > { %v1217_v27 = vadd.f32 %v1216_v18, %v1128_v22  ;;  %991 = vmatmul.bf16.gmra.mxu0 %v1735_v19  ;;  %v1779_v18 = vor.u32 %v2004_v6, %v1776_v7 }
  0xfd   : > { %1080 = vmatmul.bf16.gmra.mxu1 %v1739_v20 }
  0xfe   : > { %1169 = vmatmul.bf16.gmra.mxu2 %v1743_v25  ;;  %v1386_v29 = vadd.f32 %v2278_v21, %v1217_v27 }
  0xff   : > { %1258 = vmatmul.bf16.gmra.mxu3 %v1747_v26 }
 0x100   : > { %1418 = vst [vmem:[%s2288_s21 + $0x48] sm:$0xff] %v1386_v29 }
 0x101   : > { %v1130_v30 = vpop.f32.mrf.mxu2  ;;  %v954_v33 = vpop.f32.mrf.mxu0 }
 0x102   : > { %v1219_v31 = vpop.f32.mrf.mxu3  ;;  %v1131_v32 = vadd.f32 %v1130_v30, %v1042_v28  ;;  %v1043_v34 = vpop.f32.mrf.mxu1 }
 0x103   : > { %v1044_v45 = vadd.f32 %v1043_v34, %v954_v33 }
 0x104   : > { %v1220_v35 = vadd.f32 %v1219_v31, %v1131_v32 }
 0x106   : > { %v1387_v44 = vadd.f32 %v2278_v21, %v1220_v35 }
 0x108   : > { %1419 = vst [vmem:[%s2288_s21 + $0x50] sm:$0xff] %v1387_v44 }
 0x109   : > { %v1132_v46 = vpop.f32.mrf.mxu2  ;;  %v957_v51 = vpop.f32.mrf.mxu0 }
 0x10a   : > { %v1221_v47 = vpop.f32.mrf.mxu3  ;;  %v1133_v50 = vadd.f32 %v1132_v46, %v1044_v45  ;;  %v1046_v52 = vpop.f32.mrf.mxu1 }
 0x10b   : > { %v1047_v56 = vadd.f32 %v1046_v52, %v957_v51 }
 0x10c   : > { %v1222_v55 = vadd.f32 %v1221_v47, %v1133_v50  ;;  %996 = vmatmul.bf16.gmra.mxu0 %v1751_v48 }
 0x10d   : > { %1085 = vmatmul.bf16.gmra.mxu1 %v1755_v49 }
 0x10e   : > { %1174 = vmatmul.bf16.gmra.mxu2 %v1759_v53  ;;  %v1388_v57 = vadd.f32 %v2278_v21, %v1222_v55 }
 0x10f   : > { %1263 = vmatmul.bf16.gmra.mxu3 %v1763_v54 }
 0x110   : > { %1420 = vst [vmem:[%s2288_s21 + $0x58] sm:$0xff] %v1388_v57 }
 0x111   : > { %v1135_v58 = vpop.f32.mrf.mxu2  ;;  %v959_v61 = vpop.f32.mrf.mxu0 }
 0x112   : > { %v1224_v59 = vpop.f32.mrf.mxu3  ;;  %v1136_v60 = vadd.f32 %v1135_v58, %v1047_v56  ;;  %v1048_v62 = vpop.f32.mrf.mxu1 }
 0x113   : > { %v1049_v9 = vadd.f32 %v1048_v62, %v959_v61 }
 0x114   : > { %v1225_v63 = vadd.f32 %v1224_v59, %v1136_v60 }
 0x116   : > { %v1389_v8 = vadd.f32 %v2278_v21, %v1225_v63 }
 0x118   : > { %1421 = vst [vmem:[%s2288_s21 + $0x60] sm:$0xff] %v1389_v8 }
 0x119   : > { %v1137_v10 = vpop.f32.mrf.mxu2  ;;  %v962_v15 = vpop.f32.mrf.mxu0 }
 0x11a   : > { %v1226_v11 = vpop.f32.mrf.mxu3  ;;  %v1138_v14 = vadd.f32 %v1137_v10, %v1049_v9  ;;  %v1051_v16 = vpop.f32.mrf.mxu1 }
 0x11b   : > { %v1052_v20 = vadd.f32 %v1051_v16, %v962_v15 }
 0x11c   : > { %v1227_v19 = vadd.f32 %v1226_v11, %v1138_v14  ;;  %1001 = vmatmul.bf16.gmra.mxu0 %v1767_v12 }
 0x11d   : > { %1090 = vmatmul.bf16.gmra.mxu1 %v1771_v13 }
 0x11e   : > { %1179 = vmatmul.bf16.gmra.mxu2 %v1775_v17  ;;  %v1390_v22 = vadd.f32 %v2278_v21, %v1227_v19 }
 0x11f   : > { %1268 = vmatmul.bf16.gmra.mxu3 %v1779_v18 }
 0x120   : > { %1422 = vst [vmem:[%s2288_s21 + $0x68] sm:$0xff] %v1390_v22 }
 0x121   : > { %v1140_v23 = vpop.f32.mrf.mxu2  ;;  %v964_v26 = vpop.f32.mrf.mxu0 }
 0x122   : > { %v1229_v24 = vpop.f32.mrf.mxu3  ;;  %v1141_v25 = vadd.f32 %v1140_v23, %v1052_v20  ;;  %v1053_v27 = vpop.f32.mrf.mxu1 }
 0x123   : > { %v1054_v30 = vadd.f32 %v1053_v27, %v964_v26 }
 0x124   : > { %v1230_v28 = vadd.f32 %v1229_v24, %v1141_v25 }
 0x126   : > { %v1391_v29 = vadd.f32 %v2278_v21, %v1230_v28 }
 0x128   : > { %1423 = vst [vmem:[%s2288_s21 + $0x70] sm:$0xff] %v1391_v29 }
 0x129   : > { %v1142_v31 = vpop.f32.mrf.mxu2  ;;  %v967_v34 = vpop.f32.mrf.mxu0 }
 0x12a   : > { %v1231_v32 = vpop.f32.mrf.mxu3  ;;  %v1143_v33 = vadd.f32 %v1142_v31, %v1054_v30  ;;  %v1056_v35 = vpop.f32.mrf.mxu1 }
 0x12b   : > { %v1057_v37 = vadd.f32 %v1056_v35, %v967_v34 }
 0x12c   : > { %v1232_v36 = vadd.f32 %v1231_v32, %v1143_v33 }
 0x12e   : > { %v1392_v38 = vadd.f32 %v2278_v21, %v1232_v36 }
 0x130   : > { %1424 = vst [vmem:[%s2288_s21 + $0x78] sm:$0xff] %v1392_v38 }
 0x131   : > { %v1145_v39 = vpop.f32.mrf.mxu2  ;;  %v969_v42 = vpop.f32.mrf.mxu0 }
 0x132   : > { %v1234_v40 = vpop.f32.mrf.mxu3  ;;  %v1146_v41 = vadd.f32 %v1145_v39, %v1057_v37  ;;  %v1058_v43 = vpop.f32.mrf.mxu1 }
 0x133   : > { %v1059_v46 = vadd.f32 %v1058_v43, %v969_v42 }
 0x134   : > { %v1235_v44 = vadd.f32 %v1234_v40, %v1146_v41 }
 0x136   : > { %v1393_v45 = vadd.f32 %v2278_v21, %v1235_v44 }
 0x138   : > { %1425 = vst [vmem:[%s2288_s21 + $0x80] sm:$0xff] %v1393_v45 }
 0x139   : > { %v1147_v47 = vpop.f32.mrf.mxu2  ;;  %v972_v50 = vpop.f32.mrf.mxu0 }
 0x13a   : > { %v1236_v48 = vpop.f32.mrf.mxu3  ;;  %v1148_v49 = vadd.f32 %v1147_v47, %v1059_v46  ;;  %v1061_v51 = vpop.f32.mrf.mxu1 }
 0x13b   : > { %v1062_v53 = vadd.f32 %v1061_v51, %v972_v50 }
 0x13c   : > { %v1237_v52 = vadd.f32 %v1236_v48, %v1148_v49 }
 0x13e   : > { %v1394_v54 = vadd.f32 %v2278_v21, %v1237_v52 }
 0x140   : > { %1426 = vst [vmem:[%s2288_s21 + $0x88] sm:$0xff] %v1394_v54 }
 0x141   : > { %v1150_v55 = vpop.f32.mrf.mxu2  ;;  %v974_v58 = vpop.f32.mrf.mxu0 }
 0x142   : > { %v1239_v56 = vpop.f32.mrf.mxu3  ;;  %v1151_v57 = vadd.f32 %v1150_v55, %v1062_v53  ;;  %v1063_v59 = vpop.f32.mrf.mxu1 }
 0x143   : > { %v1064_v62 = vadd.f32 %v1063_v59, %v974_v58 }
 0x144   : > { %v1240_v60 = vadd.f32 %v1239_v56, %v1151_v57 }
 0x146   : > { %v1395_v61 = vadd.f32 %v2278_v21, %v1240_v60 }
 0x148   : > { %1427 = vst [vmem:[%s2288_s21 + $0x90] sm:$0xff] %v1395_v61 }
 0x149   : > { %v1152_v63 = vpop.f32.mrf.mxu2  ;;  %v977_v2 = vpop.f32.mrf.mxu0 }
 0x14a   : > { %v1241_v0 = vpop.f32.mrf.mxu3  ;;  %v1153_v1 = vadd.f32 %v1152_v63, %v1064_v62  ;;  %v1066_v3 = vpop.f32.mrf.mxu1 }
 0x14b   : > { %v1067_v5 = vadd.f32 %v1066_v3, %v977_v2 }
 0x14c   : > { %v1242_v4 = vadd.f32 %v1241_v0, %v1153_v1 }
 0x14e   : > { %v1396_v6 = vadd.f32 %v2278_v21, %v1242_v4 }
 0x150   : > { %1428 = vst [vmem:[%s2288_s21 + $0x98] sm:$0xff] %v1396_v6 }
 0x151   : > { %v1155_v7 = vpop.f32.mrf.mxu2  ;;  %v979_v10 = vpop.f32.mrf.mxu0 }
 0x152   : > { %v1244_v8 = vpop.f32.mrf.mxu3  ;;  %v1156_v9 = vadd.f32 %v1155_v7, %v1067_v5  ;;  %v1068_v11 = vpop.f32.mrf.mxu1 }
 0x153   : > { %v1069_v14 = vadd.f32 %v1068_v11, %v979_v10 }
 0x154   : > { %v1245_v12 = vadd.f32 %v1244_v8, %v1156_v9 }
 0x156   : > { %v1397_v13 = vadd.f32 %v2278_v21, %v1245_v12 }
 0x158   : > { %1429 = vst [vmem:[%s2288_s21 + $0xa0] sm:$0xff] %v1397_v13 }
 0x159   : > { %v1157_v15 = vpop.f32.mrf.mxu2  ;;  %v982_v18 = vpop.f32.mrf.mxu0 }
 0x15a   : > { %v1246_v16 = vpop.f32.mrf.mxu3  ;;  %v1158_v17 = vadd.f32 %v1157_v15, %v1069_v14  ;;  %v1071_v19 = vpop.f32.mrf.mxu1 }
 0x15b   : > { %v1072_v22 = vadd.f32 %v1071_v19, %v982_v18 }
 0x15c   : > { %v1247_v20 = vadd.f32 %v1246_v16, %v1158_v17 }
 0x15e   : > { %v1398_v23 = vadd.f32 %v2278_v21, %v1247_v20 }
 0x160   : > { %1430 = vst [vmem:[%s2288_s21 + $0xa8] sm:$0xff] %v1398_v23 }
 0x161   : > { %v1160_v24 = vpop.f32.mrf.mxu2  ;;  %v984_v27 = vpop.f32.mrf.mxu0 }
 0x162   : > { %v1249_v25 = vpop.f32.mrf.mxu3  ;;  %v1161_v26 = vadd.f32 %v1160_v24, %v1072_v22  ;;  %v1073_v28 = vpop.f32.mrf.mxu1 }
 0x163   : > { %v1074_v31 = vadd.f32 %v1073_v28, %v984_v27 }
 0x164   : > { %v1250_v29 = vadd.f32 %v1249_v25, %v1161_v26 }
 0x166   : > { %v1399_v30 = vadd.f32 %v2278_v21, %v1250_v29 }
 0x168   : > { %1431 = vst [vmem:[%s2288_s21 + $0xb0] sm:$0xff] %v1399_v30 }
 0x169   : > { %v1162_v32 = vpop.f32.mrf.mxu2  ;;  %v987_v35 = vpop.f32.mrf.mxu0 }
 0x16a   : > { %v1251_v33 = vpop.f32.mrf.mxu3  ;;  %v1163_v34 = vadd.f32 %v1162_v32, %v1074_v31  ;;  %v1076_v36 = vpop.f32.mrf.mxu1 }
 0x16b   : > { %v1077_v38 = vadd.f32 %v1076_v36, %v987_v35 }
 0x16c   : > { %v1252_v37 = vadd.f32 %v1251_v33, %v1163_v34 }
 0x16e   : > { %v1400_v39 = vadd.f32 %v2278_v21, %v1252_v37 }
 0x170   : > { %1432 = vst [vmem:[%s2288_s21 + $0xb8] sm:$0xff] %v1400_v39 }
 0x171   : > { %v1165_v40 = vpop.f32.mrf.mxu2  ;;  %v989_v43 = vpop.f32.mrf.mxu0 }
 0x172   : > { %v1254_v41 = vpop.f32.mrf.mxu3  ;;  %v1166_v42 = vadd.f32 %v1165_v40, %v1077_v38  ;;  %v1078_v44 = vpop.f32.mrf.mxu1 }
 0x173   : > { %v1079_v47 = vadd.f32 %v1078_v44, %v989_v43 }
 0x174   : > { %v1255_v45 = vadd.f32 %v1254_v41, %v1166_v42 }
 0x176   : > { %v1401_v46 = vadd.f32 %v2278_v21, %v1255_v45 }
 0x178   : > { %1433 = vst [vmem:[%s2288_s21 + $0xc0] sm:$0xff] %v1401_v46 }
 0x179   : > { %v1167_v48 = vpop.f32.mrf.mxu2  ;;  %v992_v51 = vpop.f32.mrf.mxu0 }
 0x17a   : > { %v1256_v49 = vpop.f32.mrf.mxu3  ;;  %v1168_v50 = vadd.f32 %v1167_v48, %v1079_v47  ;;  %v1081_v52 = vpop.f32.mrf.mxu1 }
 0x17b   : > { %v1082_v54 = vadd.f32 %v1081_v52, %v992_v51 }
 0x17c   : > { %v1257_v53 = vadd.f32 %v1256_v49, %v1168_v50 }
 0x17e   : > { %v1402_v55 = vadd.f32 %v2278_v21, %v1257_v53 }
 0x180   : > { %1434 = vst [vmem:[%s2288_s21 + $0xc8] sm:$0xff] %v1402_v55 }
 0x181   : > { %v1170_v56 = vpop.f32.mrf.mxu2  ;;  %v994_v59 = vpop.f32.mrf.mxu0 }
 0x182   : > { %v1259_v57 = vpop.f32.mrf.mxu3  ;;  %v1171_v58 = vadd.f32 %v1170_v56, %v1082_v54  ;;  %v1083_v60 = vpop.f32.mrf.mxu1 }
 0x183   : > { %v1084_v63 = vadd.f32 %v1083_v60, %v994_v59 }
 0x184   : > { %v1260_v61 = vadd.f32 %v1259_v57, %v1171_v58 }
 0x186   : > { %v1403_v62 = vadd.f32 %v2278_v21, %v1260_v61 }
 0x188   : > { %1435 = vst [vmem:[%s2288_s21 + $0xd0] sm:$0xff] %v1403_v62 }
 0x189   : > { %v1172_v0 = vpop.f32.mrf.mxu2  ;;  %v997_v3 = vpop.f32.mrf.mxu0 }
 0x18a   : > { %v1261_v1 = vpop.f32.mrf.mxu3  ;;  %v1173_v2 = vadd.f32 %v1172_v0, %v1084_v63  ;;  %v1086_v4 = vpop.f32.mrf.mxu1 }
 0x18b   : > { %v1087_v6 = vadd.f32 %v1086_v4, %v997_v3 }
 0x18c   : > { %v1262_v5 = vadd.f32 %v1261_v1, %v1173_v2 }
 0x18e   : > { %v1404_v7 = vadd.f32 %v2278_v21, %v1262_v5 }
 0x190   : > { %1436 = vst [vmem:[%s2288_s21 + $0xd8] sm:$0xff] %v1404_v7 }
 0x191   : > { %v1175_v8 = vpop.f32.mrf.mxu2  ;;  %v999_v11 = vpop.f32.mrf.mxu0 }
 0x192   : > { %v1264_v9 = vpop.f32.mrf.mxu3  ;;  %v1176_v10 = vadd.f32 %v1175_v8, %v1087_v6  ;;  %v1088_v12 = vpop.f32.mrf.mxu1 }
 0x193   : > { %v1089_v15 = vadd.f32 %v1088_v12, %v999_v11 }
 0x194   : > { %v1265_v13 = vadd.f32 %v1264_v9, %v1176_v10 }
 0x196   : > { %v1405_v14 = vadd.f32 %v2278_v21, %v1265_v13 }
 0x198   : > { %1437 = vst [vmem:[%s2288_s21 + $0xe0] sm:$0xff] %v1405_v14 }
 0x199   : > { %v1177_v16 = vpop.f32.mrf.mxu2  ;;  %v1002_v19 = vpop.f32.mrf.mxu0 }
 0x19a   : > { %v1266_v17 = vpop.f32.mrf.mxu3  ;;  %v1178_v18 = vadd.f32 %v1177_v16, %v1089_v15  ;;  %v1091_v20 = vpop.f32.mrf.mxu1 }
 0x19b   : > { %v1092_v23 = vadd.f32 %v1091_v20, %v1002_v19 }
 0x19c   : > { %v1267_v22 = vadd.f32 %v1266_v17, %v1178_v18 }
 0x19e   : > { %v1406_v24 = vadd.f32 %v2278_v21, %v1267_v22 }
 0x1a0   : > { %1438 = vst [vmem:[%s2288_s21 + $0xe8] sm:$0xff] %v1406_v24 }
 0x1a1   : > { %v1180_v25 = vpop.f32.mrf.mxu2  ;;  %v1004_v29 = vpop.f32.mrf.mxu0 }
 0x1a2   : > { %v1269_v26 = vpop.f32.mrf.mxu3  ;;  %v1181_v27 = vadd.f32 %v1180_v25, %v1092_v23  ;;  %v1093_v30 = vpop.f32.mrf.mxu1 }
 0x1a3   : > { %v1094_v32 = vadd.f32 %v1093_v30, %v1004_v29 }
 0x1a4   : > { %v1270_v28 = vadd.f32 %v1269_v26, %v1181_v27 }
 0x1a6   : > { %v1407_v31 = vadd.f32 %v2278_v21, %v1270_v28 }
 0x1a8   : > { %1439 = vst [vmem:[%s2288_s21 + $0xf0] sm:$0xff] %v1407_v31 }
 0x1a9   : > { %v1182_v33 = vpop.f32.mrf.mxu2 }
 0x1aa   : > { %v1183_v34 = vadd.f32 %v1182_v33, %v1094_v32  ;;  %v1271_v35 = vpop.f32.mrf.mxu3 }
 0x1ac   : > { %v1272_v36 = vadd.f32 %v1271_v35, %v1183_v34 }
 0x1ae   : > { %v1408_v37 = vadd.f32 %v2278_v21, %v1272_v36 }
 0x1b0   : > { %1440 = vst [vmem:[%s2288_s21 + $0xf8] sm:$0xff] %v1408_v37 }
 0x1b1 PF: > { %s13_s14 = sadd.s32 1, %s2055_s14   ;;  %s2418_s12 = smov %s2051_s13 }
 0x1b2   : > { %p10_p5 = scmp.ge.s32.totalorder %s13_s14, 4   ;;  %s2419_s13 = smov %s2421_s15 }
 0x1b4   :  { %12 = sbr.rel (!%p10_p5) target bundleno = 2 (0x2), region = 71 }

</bundles_post_ra>
